<compile_context>
chip_gen: v7x
topology: tpu7x:2x2x1
jax: 0.10.0
libtpu: 0.0.40
codegen_flags: <defaults>
</compile_context>

<pallas_src>
import functools

import jax
import jax.numpy as jnp
from jax.experimental import pallas as pl
from jax.experimental.pallas import tpu as pltpu

_LANE = 128


def _round_up(x: int, m: int) -> int:
    return (x + m - 1) // m * m


def _mlp_kernel(relu_slope, n_layers, *refs):
    """Fused MLP: (Linear -> ReLU/LeakyReLU) * (n_layers-1) -> Linear.

    refs = (x_ref, w0, b0, w1, b1, ..., w_{n-1}, b_{n-1}, o_ref)
    x_ref is one (tb, latent) f32 batch tile; weights (bf16) and biases (f32)
    are full, VMEM-resident, single-buffered blocks shared by all batch tiles.
    """
    x_ref = refs[0]
    o_ref = refs[-1]
    params = refs[1:-1]

    h = x_ref[...].astype(jnp.float32)
    for i in range(n_layers):
        w = params[2 * i][...]          # (in_i, out_i) bf16 (lane-padded)
        b = params[2 * i + 1][...]      # (1, out_i)    f32, broadcasts over batch
        # bf16 x bf16 MXU matmul with f32 accumulation; activations stay f32.
        h = jnp.dot(h.astype(jnp.bfloat16), w,
                    preferred_element_type=jnp.float32) + b
        if i < n_layers - 1:
            if relu_slope > 0.0:
                # LeakyReLU via a single VPU max (valid for 0 < slope < 1).
                h = jnp.maximum(h, relu_slope * h)
            else:
                h = jnp.maximum(h, 0.0)
        # Zero-padded lanes stay exactly zero through bias(0)+activation, so
        # padding never contaminates the real columns.
    o_ref[...] = h.astype(o_ref.dtype)


def prepare_params(weights, biases):
    """One-time parameter prep (hoisted out of the per-call forward).

    weights[i]: (in_i, out_i) == PyTorch weight.T   -> bf16, N zero-padded to
                a multiple of 128 (and K padded to match the previous layer).
    biases[i]:  (out_i,)                            -> f32, shape (1, out_pad).
    """
    w_out, b_out = [], []
    prev_n_pad = 0
    for w, b in zip(weights, biases):
        w = jnp.asarray(w, jnp.float32)
        b = jnp.asarray(b, jnp.float32)
        _, n = w.shape
        n_pad = _round_up(n, _LANE) - n
        w = jnp.pad(w, ((0, prev_n_pad), (0, n_pad)))
        b = jnp.pad(b, ((0, n_pad),)).reshape(1, -1)
        w_out.append(w.astype(jnp.bfloat16))
        b_out.append(b)
        prev_n_pad = n_pad
    return tuple(w_out), tuple(b_out)


def _resident_spec(shape):
    # Constant index_map -> the block is identical on every grid step, so it
    # is DMA'd once and kept VMEM-resident; Buffered(1) disables the second
    # (useless) pipeline buffer and halves its VMEM footprint.
    return pl.BlockSpec(shape, lambda i: (0, 0), pipeline_mode=pl.Buffered(1))


@functools.partial(
    jax.jit,
    static_argnames=("num_points", "num_features", "relu_slope", "batch_tile"))
def linear_decoder_forward(z, w_bf16, b_f32, *, num_points, num_features=0,
                           relu_slope=0.0, batch_tile=256):
    """JAX wrapper reproducing LinearDecoder.forward.

    batch_tile: 256 fills the 256-wide MXU on v6e/v7x; use 128 on v5e.
    """
    # z.squeeze() in PyTorch (removes all size-1 dims).
    z = jnp.squeeze(z)
    if z.ndim == 1:
        z = z[None, :]
    z = z.astype(jnp.float32)

    n_layers = len(w_bf16)
    batch, latent = z.shape
    out_dim = num_points * (3 + num_features)
    out_pad = w_bf16[-1].shape[1]            # lane-dense padded output width

    # Batch tile: multiple of 16 (bf16 sublane pack of the casted LHS),
    # capped by the (rounded-up) batch so tiny batches stay a single tile.
    tb = max(16, min(_round_up(batch_tile, 16), _round_up(batch, 16)))
    padded = _round_up(batch, tb)
    if padded != batch:
        z = jnp.pad(z, ((0, padded - batch), (0, 0)))
    grid = (padded // tb,)

    args = [z]
    in_specs = [pl.BlockSpec((tb, latent), lambda i: (i, 0))]
    flops = 0
    param_bytes = 0
    max_width = out_pad
    for w, b in zip(w_bf16, b_f32):
        args.append(w)
        args.append(b)
        in_specs.append(_resident_spec(w.shape))
        in_specs.append(_resident_spec(b.shape))
        flops += 2 * padded * w.shape[0] * w.shape[1]
        param_bytes += w.size * w.dtype.itemsize + b.size * 4
        max_width = max(max_width, w.shape[1])

    bytes_accessed = z.size * 4 + padded * out_pad * 4 + param_bytes

    # Derived VMEM budget: single-buffered params + double-buffered in/out
    # activation tiles + live f32 intermediates, with 2x headroom for compiler
    # scratch, clamped to v7x's 64 MiB physical VMEM (safe on v5e/v6e too).
    act_bytes = 2 * tb * (latent + out_pad) * 4
    inter_bytes = 3 * tb * max_width * 4
    vmem_limit = min(64 * 1024 * 1024,
                     max(16 * 1024 * 1024,
                         2 * (param_bytes + act_bytes + inter_bytes)))

    kernel = functools.partial(_mlp_kernel, relu_slope, n_layers)

    flat = pl.pallas_call(
        kernel,
        out_shape=jax.ShapeDtypeStruct((padded, out_pad), jnp.float32),
        grid=grid,
        in_specs=in_specs,
        out_specs=pl.BlockSpec((tb, out_pad), lambda i: (i, 0)),
        compiler_params=pltpu.CompilerParams(
            dimension_semantics=("parallel",),   # batch tiles are independent
            vmem_limit_bytes=vmem_limit,
        ),
        cost_estimate=pl.CostEstimate(
            flops=flops, transcendentals=0, bytes_accessed=bytes_accessed),
    )(*args)

    flat = flat[:batch, :out_dim]
    # output.view(-1, 3 + num_features, num_points)
    return flat.reshape(-1, 3 + num_features, num_points)


def _init_params(key, latent_dim, affine_widths, num_points, num_features):
    """Deterministic init mimicking nn.Linear default (uniform +-1/sqrt(fan_in))."""
    dims = [latent_dim] + list(affine_widths) + [num_points * (3 + num_features)]
    weights, biases = [], []
    for i in range(len(dims) - 1):
        fan_in, fan_out = dims[i], dims[i + 1]
        key, kw, kb = jax.random.split(key, 3)
        bound = 1.0 / (fan_in ** 0.5)
        w = jax.random.uniform(kw, (fan_in, fan_out), jnp.float32, -bound, bound)
        b = jax.random.uniform(kb, (fan_out,), jnp.float32, -bound, bound)
        weights.append(w)
        biases.append(b)
    return weights, biases


if __name__ == "__main__":
    # Module hyperparameters (defaults of the PyTorch module, small sizes).
    num_points = 16
    num_features = 0
    latent_dim = 20
    affine_widths = [64, 128, 512, 1024]
    relu_slope = 0.0          # -> ReLU (default)
    batch = 2

    key = jax.random.PRNGKey(0)
    key, kz = jax.random.split(key)
    weights, biases = _init_params(key, latent_dim, affine_widths,
                                   num_points, num_features)
    # Hoisted one-time cast/pad to kernel layouts (bf16 weights, f32 biases,
    # lane-dense widths).
    w_bf16, b_f32 = prepare_params(weights, biases)

    # z of shape (batch, 1, latent_dim): squeeze() -> (batch, latent_dim).
    z = jax.random.normal(kz, (batch, 1, latent_dim), jnp.float32)

    out = linear_decoder_forward(z, w_bf16, b_f32,
                                 num_points=num_points,
                                 num_features=num_features,
                                 relu_slope=relu_slope)
    out = jax.block_until_ready(out)

    # Full-precision f32 reference (the PyTorch LinearDecoder numerics); the
    # tolerance bounds the bf16-operand / f32-accumulate deviation.
    h = jnp.squeeze(z).astype(jnp.float32)
    if h.ndim == 1:
        h = h[None, :]
    for i, (w, b) in enumerate(zip(weights, biases)):
        h = h @ w + b
        if i < len(weights) - 1:
            h = jnp.maximum(h, 0.0) if relu_slope == 0.0 else jnp.maximum(h, relu_slope * h)
    ref_f32 = h.reshape(-1, 3 + num_features, num_points)

    assert out.shape == (batch, 3 + num_features, num_points), out.shape
    max_err = float(jnp.max(jnp.abs(out - ref_f32)))
    assert jnp.allclose(out, ref_f32, atol=2e-2, rtol=2e-2), (
        f"mismatch vs f32 reference, max abs err = {max_err}")
    print("KERNEL_OK")
</pallas_src>

<mosaic_0001>
module attributes {stable_mosaic.version = 11 : i64} {
  func.func @_mlp_kernel(%arg0: i32, %arg1: memref<16x20xf32, #tpu.memory_space<vmem>>, %arg2: memref<20x128xbf16, #tpu.memory_space<vmem>>, %arg3: memref<1x128xf32, #tpu.memory_space<vmem>>, %arg4: memref<128x128xbf16, #tpu.memory_space<vmem>>, %arg5: memref<1x128xf32, #tpu.memory_space<vmem>>, %arg6: memref<128x512xbf16, #tpu.memory_space<vmem>>, %arg7: memref<1x512xf32, #tpu.memory_space<vmem>>, %arg8: memref<512x1024xbf16, #tpu.memory_space<vmem>>, %arg9: memref<1x1024xf32, #tpu.memory_space<vmem>>, %arg10: memref<1024x128xbf16, #tpu.memory_space<vmem>>, %arg11: memref<1x128xf32, #tpu.memory_space<vmem>>, %arg12: memref<16x128xf32, #tpu.memory_space<vmem>>) attributes {dimension_semantics = [#tpu.dimension_semantics<parallel>], iteration_bounds = array<i64: 1>, scalar_prefetch = 0 : i64, scratch_operands = 0 : i64, tpu.core_type = #tpu.core_type<tc>, window_params = [{transform_indices = @transform_0, window_bounds = array<i64: 16, 20>}, {pipeline_mode = #tpu.pipeline_mode<synchronous>, transform_indices = @transform_1, window_bounds = array<i64: 20, 128>}, {pipeline_mode = #tpu.pipeline_mode<synchronous>, transform_indices = @transform_2, window_bounds = array<i64: 1, 128>}, {pipeline_mode = #tpu.pipeline_mode<synchronous>, transform_indices = @transform_3, window_bounds = array<i64: 128, 128>}, {pipeline_mode = #tpu.pipeline_mode<synchronous>, transform_indices = @transform_4, window_bounds = array<i64: 1, 128>}, {pipeline_mode = #tpu.pipeline_mode<synchronous>, transform_indices = @transform_5, window_bounds = array<i64: 128, 512>}, {pipeline_mode = #tpu.pipeline_mode<synchronous>, transform_indices = @transform_6, window_bounds = array<i64: 1, 512>}, {pipeline_mode = #tpu.pipeline_mode<synchronous>, transform_indices = @transform_7, window_bounds = array<i64: 512, 1024>}, {pipeline_mode = #tpu.pipeline_mode<synchronous>, transform_indices = @transform_8, window_bounds = array<i64: 1, 1024>}, {pipeline_mode = #tpu.pipeline_mode<synchronous>, transform_indices = @transform_9, window_bounds = array<i64: 1024, 128>}, {pipeline_mode = #tpu.pipeline_mode<synchronous>, transform_indices = @transform_10, window_bounds = array<i64: 1, 128>}, {transform_indices = @transform_11, window_bounds = array<i64: 16, 128>}]} {
    %c0 = arith.constant 0 : index
    %c0_0 = arith.constant 0 : index
    %0 = vector.load %arg1[%c0, %c0_0] : memref<16x20xf32, #tpu.memory_space<vmem>>, vector<16x20xf32>
    %c0_1 = arith.constant 0 : index
    %c0_2 = arith.constant 0 : index
    %1 = vector.load %arg2[%c0_1, %c0_2] : memref<20x128xbf16, #tpu.memory_space<vmem>>, vector<20x128xbf16>
    %c0_3 = arith.constant 0 : index
    %c0_4 = arith.constant 0 : index
    %2 = vector.load %arg3[%c0_3, %c0_4] : memref<1x128xf32, #tpu.memory_space<vmem>>, vector<1x128xf32>
    %3 = arith.truncf %0 : vector<16x20xf32> to vector<16x20xbf16>
    %cst = arith.constant dense<0.000000e+00> : vector<16x128xf32>
    %4 = tpu.matmul %3, %1, %cst {dimension_numbers = #tpu.dot_dimension_numbers<[1], [0], [0], [1], [0, 0, 1, 1], [], []>} : vector<16x20xbf16>, vector<20x128xbf16>, vector<16x128xf32> -> vector<16x128xf32>
    %5 = vector.broadcast %2 : vector<1x128xf32> to vector<16x128xf32>
    %6 = arith.addf %4, %5 : vector<16x128xf32>
    %cst_5 = arith.constant 0.000000e+00 : f32
    %7 = vector.broadcast %cst_5 : f32 to vector<16x128xf32>
    %8 = arith.maximumf %6, %7 : vector<16x128xf32>
    %c0_6 = arith.constant 0 : index
    %c0_7 = arith.constant 0 : index
    %9 = vector.load %arg4[%c0_6, %c0_7] : memref<128x128xbf16, #tpu.memory_space<vmem>>, vector<128x128xbf16>
    %c0_8 = arith.constant 0 : index
    %c0_9 = arith.constant 0 : index
    %10 = vector.load %arg5[%c0_8, %c0_9] : memref<1x128xf32, #tpu.memory_space<vmem>>, vector<1x128xf32>
    %11 = arith.truncf %8 : vector<16x128xf32> to vector<16x128xbf16>
    %cst_10 = arith.constant dense<0.000000e+00> : vector<16x128xf32>
    %12 = tpu.matmul %11, %9, %cst_10 {dimension_numbers = #tpu.dot_dimension_numbers<[1], [0], [0], [1], [0, 0, 1, 1], [], []>} : vector<16x128xbf16>, vector<128x128xbf16>, vector<16x128xf32> -> vector<16x128xf32>
    %13 = vector.broadcast %10 : vector<1x128xf32> to vector<16x128xf32>
    %14 = arith.addf %12, %13 : vector<16x128xf32>
    %cst_11 = arith.constant 0.000000e+00 : f32
    %15 = vector.broadcast %cst_11 : f32 to vector<16x128xf32>
    %16 = arith.maximumf %14, %15 : vector<16x128xf32>
    %c0_12 = arith.constant 0 : index
    %c0_13 = arith.constant 0 : index
    %17 = vector.load %arg6[%c0_12, %c0_13] : memref<128x512xbf16, #tpu.memory_space<vmem>>, vector<128x512xbf16>
    %c0_14 = arith.constant 0 : index
    %c0_15 = arith.constant 0 : index
    %18 = vector.load %arg7[%c0_14, %c0_15] : memref<1x512xf32, #tpu.memory_space<vmem>>, vector<1x512xf32>
    %19 = arith.truncf %16 : vector<16x128xf32> to vector<16x128xbf16>
    %cst_16 = arith.constant dense<0.000000e+00> : vector<16x512xf32>
    %20 = tpu.matmul %19, %17, %cst_16 {dimension_numbers = #tpu.dot_dimension_numbers<[1], [0], [0], [1], [0, 0, 1, 1], [], []>} : vector<16x128xbf16>, vector<128x512xbf16>, vector<16x512xf32> -> vector<16x512xf32>
    %21 = vector.broadcast %18 : vector<1x512xf32> to vector<16x512xf32>
    %22 = arith.addf %20, %21 : vector<16x512xf32>
    %cst_17 = arith.constant 0.000000e+00 : f32
    %23 = vector.broadcast %cst_17 : f32 to vector<16x512xf32>
    %24 = arith.maximumf %22, %23 : vector<16x512xf32>
    %c0_18 = arith.constant 0 : index
    %c0_19 = arith.constant 0 : index
    %25 = vector.load %arg8[%c0_18, %c0_19] : memref<512x1024xbf16, #tpu.memory_space<vmem>>, vector<512x1024xbf16>
    %c0_20 = arith.constant 0 : index
    %c0_21 = arith.constant 0 : index
    %26 = vector.load %arg9[%c0_20, %c0_21] : memref<1x1024xf32, #tpu.memory_space<vmem>>, vector<1x1024xf32>
    %27 = arith.truncf %24 : vector<16x512xf32> to vector<16x512xbf16>
    %cst_22 = arith.constant dense<0.000000e+00> : vector<16x1024xf32>
    %28 = tpu.matmul %27, %25, %cst_22 {dimension_numbers = #tpu.dot_dimension_numbers<[1], [0], [0], [1], [0, 0, 1, 1], [], []>} : vector<16x512xbf16>, vector<512x1024xbf16>, vector<16x1024xf32> -> vector<16x1024xf32>
    %29 = vector.broadcast %26 : vector<1x1024xf32> to vector<16x1024xf32>
    %30 = arith.addf %28, %29 : vector<16x1024xf32>
    %cst_23 = arith.constant 0.000000e+00 : f32
    %31 = vector.broadcast %cst_23 : f32 to vector<16x1024xf32>
    %32 = arith.maximumf %30, %31 : vector<16x1024xf32>
    %c0_24 = arith.constant 0 : index
    %c0_25 = arith.constant 0 : index
    %33 = vector.load %arg10[%c0_24, %c0_25] : memref<1024x128xbf16, #tpu.memory_space<vmem>>, vector<1024x128xbf16>
    %c0_26 = arith.constant 0 : index
    %c0_27 = arith.constant 0 : index
    %34 = vector.load %arg11[%c0_26, %c0_27] : memref<1x128xf32, #tpu.memory_space<vmem>>, vector<1x128xf32>
    %35 = arith.truncf %32 : vector<16x1024xf32> to vector<16x1024xbf16>
    %cst_28 = arith.constant dense<0.000000e+00> : vector<16x128xf32>
    %36 = tpu.matmul %35, %33, %cst_28 {dimension_numbers = #tpu.dot_dimension_numbers<[1], [0], [0], [1], [0, 0, 1, 1], [], []>} : vector<16x1024xbf16>, vector<1024x128xbf16>, vector<16x128xf32> -> vector<16x128xf32>
    %37 = vector.broadcast %34 : vector<1x128xf32> to vector<16x128xf32>
    %38 = arith.addf %36, %37 : vector<16x128xf32>
    %c0_29 = arith.constant 0 : index
    %c0_30 = arith.constant 0 : index
    %39 = vector.load %arg12[%c0_29, %c0_30] : memref<16x128xf32, #tpu.memory_space<vmem>>, vector<16x128xf32>
    tpu.vector_store %arg12[%c0_29, %c0_30], %38 {strides = array<i32>} : memref<16x128xf32, #tpu.memory_space<vmem>>, vector<16x128xf32>,
    return
  }
  func.func @transform_0(%arg0: i32) -> (i32, i32) {
    %c0_i32 = arith.constant 0 : i32
    %c0_i32_0 = arith.constant 0 : i32
    return %arg0, %c0_i32 : i32, i32
  }
  func.func @transform_1(%arg0: i32) -> (i32, i32) {
    %c0_i32 = arith.constant 0 : i32
    %c0_i32_0 = arith.constant 0 : i32
    %c0_i32_1 = arith.constant 0 : i32
    return %c0_i32, %c0_i32_0 : i32, i32
  }
  func.func @transform_2(%arg0: i32) -> (i32, i32) {
    %c0_i32 = arith.constant 0 : i32
    %c0_i32_0 = arith.constant 0 : i32
    %c0_i32_1 = arith.constant 0 : i32
    return %c0_i32, %c0_i32_0 : i32, i32
  }
  func.func @transform_3(%arg0: i32) -> (i32, i32) {
    %c0_i32 = arith.constant 0 : i32
    %c0_i32_0 = arith.constant 0 : i32
    %c0_i32_1 = arith.constant 0 : i32
    return %c0_i32, %c0_i32_0 : i32, i32
  }
  func.func @transform_4(%arg0: i32) -> (i32, i32) {
    %c0_i32 = arith.constant 0 : i32
    %c0_i32_0 = arith.constant 0 : i32
    %c0_i32_1 = arith.constant 0 : i32
    return %c0_i32, %c0_i32_0 : i32, i32
  }
  func.func @transform_5(%arg0: i32) -> (i32, i32) {
    %c0_i32 = arith.constant 0 : i32
    %c0_i32_0 = arith.constant 0 : i32
    %c0_i32_1 = arith.constant 0 : i32
    return %c0_i32, %c0_i32_0 : i32, i32
  }
  func.func @transform_6(%arg0: i32) -> (i32, i32) {
    %c0_i32 = arith.constant 0 : i32
    %c0_i32_0 = arith.constant 0 : i32
    %c0_i32_1 = arith.constant 0 : i32
    return %c0_i32, %c0_i32_0 : i32, i32
  }
  func.func @transform_7(%arg0: i32) -> (i32, i32) {
    %c0_i32 = arith.constant 0 : i32
    %c0_i32_0 = arith.constant 0 : i32
    %c0_i32_1 = arith.constant 0 : i32
    return %c0_i32, %c0_i32_0 : i32, i32
  }
  func.func @transform_8(%arg0: i32) -> (i32, i32) {
    %c0_i32 = arith.constant 0 : i32
    %c0_i32_0 = arith.constant 0 : i32
    %c0_i32_1 = arith.constant 0 : i32
    return %c0_i32, %c0_i32_0 : i32, i32
  }
  func.func @transform_9(%arg0: i32) -> (i32, i32) {
    %c0_i32 = arith.constant 0 : i32
    %c0_i32_0 = arith.constant 0 : i32
    %c0_i32_1 = arith.constant 0 : i32
    return %c0_i32, %c0_i32_0 : i32, i32
  }
  func.func @transform_10(%arg0: i32) -> (i32, i32) {
    %c0_i32 = arith.constant 0 : i32
    %c0_i32_0 = arith.constant 0 : i32
    %c0_i32_1 = arith.constant 0 : i32
    return %c0_i32, %c0_i32_0 : i32, i32
  }
  func.func @transform_11(%arg0: i32) -> (i32, i32) {
    %c0_i32 = arith.constant 0 : i32
    %c0_i32_0 = arith.constant 0 : i32
    return %arg0, %c0_i32 : i32, i32
  }
}

</mosaic_0001>

<bundles_post_ra>
// kernel: linear_decoder_forward.1
= control target key start
LH: loop header
LB: loop body
LE: loop exit
PB: predicated region body
PF: predicated region fallthrough
CT: control target
= control target key end

     0   :  { %16 = vsyncpa [#allocation3], 0  ;;  %s4220_s0 = inlined_call_operand.vmem [shape: f32[16,20], index: 0, kind: input, shape index: {}]   ;;  %s4221_s1 = inlined_call_operand.vmem [shape: bf16[20,128], index: 1, kind: input, shape index: {}]   ;;  %s4222_s2 = inlined_call_operand.vmem [shape: f32[1,128], index: 2, kind: input, shape index: {}]   ;;  %s4223_s3 = inlined_call_operand.hbm [shape: bf16[128,128], index: 3, kind: input, shape index: {}]   ;;  %s4224_s4 = inlined_call_operand.vmem [shape: f32[1,128], index: 4, kind: input, shape index: {}]   ;;  %s4225_s5 = inlined_call_operand.hbm [shape: bf16[128,512], index: 5, kind: input, shape index: {}]   ;;  %s4226_s6 = inlined_call_operand.vmem [shape: f32[1,512], index: 6, kind: input, shape index: {}]   ;;  %s4227_s7 = inlined_call_operand.hbm [shape: bf16[512,1024], index: 7, kind: input, shape index: {}]   ;;  %s4228_s8 = inlined_call_operand.vmem [shape: f32[1,1024], index: 8, kind: input, shape index: {}]   ;;  %s4229_s9 = inlined_call_operand.hbm [shape: bf16[1024,128], index: 9, kind: input, shape index: {}]   ;;  %s4230_s10 = inlined_call_operand.vmem [shape: f32[1,128], index: 10, kind: input, shape index: {}]   ;;  %s4231_s11 = inlined_call_operand.vmem [shape: f32[16,128], index: 11, kind: output, shape index: {}]  }
   0x1   :  { %17 = vsyncpa [#allocation5], 0 }
   0x2   :  { %18 = vsyncpa [#allocation8], 0  ;;  %s3988_s17 = smov [#allocation4]   ;;  %s3894_s21 = scalar_lea.hbm %s4225_s5, 4096 }
   0x3   :  { %s44_s18 = sshll.u32 %s3988_s17, 4  ;;  %p3895_p0 = scmp.ne.s32.totalorder %s4225_s5, %s3894_s21  ;;  %s45_s18 = int_to_ptr.vmem [resolvable:$true] %s44_s18 }
   0x4   :  { %p3898_p1 = scmp.lt.u32.totalorder %s3894_s21, %s4225_s5 }
   0x6   :  { %p3900_p2 = pnand %p3898_p1, %p3895_p0 }
   0x8   :  { %3903 = shalt.err (!%p3900_p2)
}
   0x9   :  { %s3904_s26 = scalar_lea.vmem %s45_s18, 4096  ;;  %p3909_p4 = scmp.lt.s32.totalorder %s45_s18, %s45_s18 }
   0xa   :  { %p3905_p3 = scmp.ne.s32.totalorder %s45_s18, %s3904_s26  ;;  %p3910_p5 = scmp.lt.s32.totalorder %s3904_s26, %s3904_s26 }
   0xc   :  { %p3911_p6 = por %p3910_p5, %p3909_p4 }
   0xe   :  { %p3912_p7 = pnand %p3911_p6, %p3905_p3 }
  0x10   :  { %3915 = shalt.err (!%p3912_p7)
}
  0x11   :  { %s3989_s27 = smov 256   ;;  %s3990_s28 = smov 16  }
  0x12   :  { %50 = dma.hbm_to_vmem [thread:$0]  %s4225_s5, 4096, %s45_s18, [#allocation5], %s3989_s27, %s3989_s27, %s3990_s28  }
  0x13   :  { %s3991_s12 = smov [#allocation2]   ;;  %s3916_s16 = scalar_lea.hbm %s4223_s3, 1024 }
  0x14   :  { %s30_s13 = sshll.u32 %s3991_s12, 4  ;;  %p3917_p8 = scmp.ne.s32.totalorder %s4223_s3, %s3916_s16  ;;  %s31_s13 = int_to_ptr.vmem [resolvable:$true] %s30_s13 }
  0x15   :  { %p3920_p9 = scmp.lt.u32.totalorder %s3916_s16, %s4223_s3 }
  0x17   :  { %p3922_p10 = pnand %p3920_p9, %p3917_p8 }
  0x19   :  { %3925 = shalt.err (!%p3922_p10)
}
  0x1a   :  { %s3926_s22 = scalar_lea.vmem %s31_s13, 1024  ;;  %p3931_p12 = scmp.lt.s32.totalorder %s31_s13, %s31_s13 }
  0x1b   :  { %p3927_p11 = scmp.ne.s32.totalorder %s31_s13, %s3926_s22  ;;  %p3932_p13 = scmp.lt.s32.totalorder %s3926_s22, %s3926_s22 }
  0x1d   :  { %p3933_p0 = por %p3932_p13, %p3931_p12 }
  0x1f   :  { %p3934_p1 = pnand %p3933_p0, %p3927_p11 }
  0x21   :  { %3937 = shalt.err (!%p3934_p1)
}
  0x22   :  { %s3992_s5 = smov 64   ;;  %s3993_s18 = smov 4  }
  0x23   :  { %36 = dma.hbm_to_vmem [thread:$0]  %s4223_s3, 1024, %s31_s13, [#allocation3], %s3992_s5, %s3992_s5, %s3993_s18  }
  0x24   :  { %s3994_s25 = smov [#allocation6]   ;;  %s3938_s29 = scalar_lea.hbm %s4227_s7, 32768 }
  0x25   :  { %s58_s26 = sshll.u32 %s3994_s25, 4  ;;  %p3939_p2 = scmp.ne.s32.totalorder %s4227_s7, %s3938_s29  ;;  %s59_s26 = int_to_ptr.vmem [resolvable:$true] %s58_s26 }
  0x26   :  { %p3942_p3 = scmp.lt.u32.totalorder %s3938_s29, %s4227_s7 }
  0x28   :  { %p3944_p4 = pnand %p3942_p3, %p3939_p2 }
  0x2a   :  { %3947 = shalt.err (!%p3944_p4)
}
  0x2b   :  { %s3948_s16 = scalar_lea.vmem %s59_s26, 32768  ;;  %p3953_p6 = scmp.lt.s32.totalorder %s59_s26, %s59_s26 }
  0x2c   :  { %p3949_p5 = scmp.ne.s32.totalorder %s59_s26, %s3948_s16  ;;  %p3954_p7 = scmp.lt.s32.totalorder %s3948_s16, %s3948_s16 }
  0x2e   :  { %p3955_p8 = por %p3954_p7, %p3953_p6 }
  0x30   :  { %p3956_p9 = pnand %p3955_p8, %p3949_p5 }
  0x32   :  { %3959 = shalt.err (!%p3956_p9)
}
  0x33   :  { %s3995_s3 = smov 512   ;;  %s3996_s13 = smov 32  }
  0x34   :  { %64 = dma.hbm_to_vmem [thread:$0]  %s4227_s7, 32768, %s59_s26, [#allocation5], %s3995_s3, %s3995_s3, %s3996_s13  }
  0x35   :  { %s3997_s20 = smov [#allocation7]   ;;  %s3960_s24 = scalar_lea.hbm %s4229_s9, 8192 }
  0x36   :  { %s72_s21 = sshll.u32 %s3997_s20, 4  ;;  %p3961_p10 = scmp.ne.s32.totalorder %s4229_s9, %s3960_s24  ;;  %s73_s21 = int_to_ptr.vmem [resolvable:$true] %s72_s21 }
  0x37   :  { %p3964_p11 = scmp.lt.u32.totalorder %s3960_s24, %s4229_s9 }
  0x39   :  { %p3966_p12 = pnand %p3964_p11, %p3961_p10 }
  0x3b   :  { %3969 = shalt.err (!%p3966_p12)
}
  0x3c   :  { %s3970_s30 = scalar_lea.vmem %s73_s21, 8192  ;;  %p3975_p0 = scmp.lt.s32.totalorder %s73_s21, %s73_s21 }
  0x3d   :  { %p3971_p13 = scmp.ne.s32.totalorder %s73_s21, %s3970_s30  ;;  %p3976_p1 = scmp.lt.s32.totalorder %s3970_s30, %s3970_s30 }
  0x3f   :  { %p3977_p2 = por %p3976_p1, %p3975_p0 }
  0x41   :  { %p3978_p3 = pnand %p3977_p2, %p3971_p13 }
  0x43   :  { %3981 = shalt.err (!%p3978_p3)
}
  0x44   :  { %78 = dma.hbm_to_vmem [thread:$0]  %s4229_s9, 8192, %s73_s21, [#allocation8], %s3992_s5, %s3992_s5, %s3993_s18  }
  0x45   :  { %3982 = dma.done.wait [#allocation3], 1024  }
  0x46   :  { %3983 = vsyncadd [#allocation3], 4294966272 }
  0x47   :  { %3984 = dma.done.wait [#allocation5], 36864  }
  0x48   :  { %3985 = vsyncadd [#allocation5], 4294930432 }
  0x49   :  { %3986 = dma.done.wait [#allocation8], 8192  }
  0x4a   :  { %3987 = vsyncadd [#allocation8], 4294959104  ;;  %v3998_v0 = vmov 0.0   ;;  %vm3999_vm0 = vmmov 0   ;;  %v3772_v1 = vld [vmem:[%s4221_s1] sm:$0xff]   ;;  %vm120_vm1 = vcmask 1041408  }
  0x4b   :  { %3699 = vmatprep.subr.bf16.mxu0 %v3998_v0  ;;  %3703 = vmatprep.mubr.msk.bf16.mxu0 %vm3999_vm0, %v3998_v0  ;;  %v3773_v2 = vld [vmem:[%s4221_s1 + $0x8] ss:$0 sps:$4 sm:$0x33]   ;;  %v94_v3 = vld [vmem:[%s4220_s0] sm:$0xff]  ;;  %vm116_vm2 = vcmask 162816   ;;  %v3776_v9 = vld [vmem:[#allocation2 + $0x10] sm:$0xff]  }
  0x4c   :  { %3707 = vmatprep.subr.bf16.mxu1 %v3998_v0  ;;  %3723 = vmatprep.mubr.msk.bf16.mxu1 %vm3999_vm0, %v3998_v0  ;;  %v95_v4 = vld [vmem:[%s4220_s0 + $0x8] sm:$0xff]  ;;  %v122_v5 = vsel %vm120_vm1, %v3773_v2, 0  ;;  %v3774_v6 = vld [vmem:[#allocation2] sm:$0xff]   ;;  %v3777_v10 = vld [vmem:[#allocation2 + $0x18] sm:$0xff]   ;;  %v4000_v57 = vmov 0  }
  0x4d   :  { %3700 = vmatpush3.bf16.msra.mxu0 %v3772_v1  ;;  %v100_v7 = vpack.c.bf16 %v95_v4, %v94_v3  ;;  %3708 = vmatpush3.bf16.msra.mxu1 %v3774_v6  ;;  %v3775_v8 = vld [vmem:[#allocation2 + $0x8] sm:$0xff]   ;;  %v3778_v11 = vld [vmem:[#allocation2 + $0x20] sm:$0xff]   ;;  %v3780_v13 = vld [vmem:[#allocation2 + $0x30] sm:$0xff]  }
  0x4e   :  { %3701 = vmatprep.subr.bf16.mxu0 %v3998_v0  ;;  %3709 = vmatprep.subr.bf16.mxu1 %v3998_v0  ;;  %v3779_v12 = vld [vmem:[#allocation2 + $0x28] sm:$0xff]   ;;  %v3781_v14 = vld [vmem:[#allocation2 + $0x38] sm:$0xff]   ;;  %v3782_v15 = vld [vmem:[#allocation4] ss:$16 sps:$4 sm:$0xff]  }
  0x4f   :  { %v3784_v16 = vld [vmem:[#allocation4 + $0x4] ss:$16 sps:$4 sm:$0xff]   ;;  %v3787_v17 = vld [vmem:[#allocation4 + $0xc] ss:$16 sps:$4 sm:$0xff]   ;;  %v3788_v19 = vld [vmem:[#allocation4 + $0x20] ss:$16 sps:$4 sm:$0xff]  }
  0x50   :  { %v3790_v18 = vld [vmem:[#allocation4 + $0x24] ss:$16 sps:$4 sm:$0xff]   ;;  %v3794_v21 = vld [vmem:[#allocation4 + $0x40] ss:$16 sps:$4 sm:$0xff]   ;;  %v3785_v37 = vld [vmem:[#allocation4 + $0x8] ss:$16 sps:$4 sm:$0xff]  }
  0x51   :  { %3702 = vmatpush3.bf16.msra.mxu0 %v122_v5  ;;  %3710 = vmatpush3.bf16.msra.mxu1 %v3775_v8  ;;  %v3796_v20 = vld [vmem:[#allocation4 + $0x44] ss:$16 sps:$4 sm:$0xff]   ;;  %v3800_v23 = vld [vmem:[#allocation4 + $0x60] ss:$16 sps:$4 sm:$0xff]   ;;  %v3793_v39 = vld [vmem:[#allocation4 + $0x2c] ss:$16 sps:$4 sm:$0xff]  }
  0x52   :  { %3711 = vmatprep.subr.bf16.mxu1 %v3998_v0  ;;  %497 = vmatprep.subr.bf16.mxu0 %v3784_v16  ;;  %v3802_v22 = vld [vmem:[#allocation4 + $0x64] ss:$16 sps:$4 sm:$0xff]   ;;  %v3806_v25 = vld [vmem:[#allocation4 + $0x80] ss:$16 sps:$4 sm:$0xff]   ;;  %v3791_v40 = vld [vmem:[#allocation4 + $0x28] ss:$16 sps:$4 sm:$0xff]  }
  0x53   :  { %v3808_v24 = vld [vmem:[#allocation4 + $0x84] ss:$16 sps:$4 sm:$0xff]   ;;  %v3812_v27 = vld [vmem:[#allocation4 + $0xa0] ss:$16 sps:$4 sm:$0xff]   ;;  %v3799_v41 = vld [vmem:[#allocation4 + $0x4c] ss:$16 sps:$4 sm:$0xff]  }
  0x54   :  { %3704 = vmatmul.mubr.msk.bf16.vlgmr.msra.gmra.mrb[0].mxu0 %vm116_vm2, %v100_v7  ;;  %v3814_v26 = vld [vmem:[#allocation4 + $0xa4] ss:$16 sps:$4 sm:$0xff]   ;;  %v3233_v28 = vld [vmem:[%s4222_s2] ss:$0 sm:$0xff]  ;;  %v3797_v42 = vld [vmem:[#allocation4 + $0x48] ss:$16 sps:$4 sm:$0xff]  }
  0x55   :  { %3712 = vmatpush3.bf16.msra.mxu1 %v3776_v9  ;;  %498 = vmatpush1.bf16.msra.mxu0 %v3782_v15  ;;  %v3805_v43 = vld [vmem:[#allocation4 + $0x6c] ss:$16 sps:$4 sm:$0xff]   ;;  %v3803_v44 = vld [vmem:[#allocation4 + $0x68] ss:$16 sps:$4 sm:$0xff]   ;;  %v3820_v49 = vld [vmem:[#allocation4 + $0xc4] ss:$16 sps:$4 sm:$0xff]  }
  0x56   :  { %3713 = vmatprep.subr.bf16.mxu1 %v3998_v0  ;;  %499 = vmatprep.subr.bf16.mxu0 %v3790_v18  ;;  %v3811_v45 = vld [vmem:[#allocation4 + $0x8c] ss:$16 sps:$4 sm:$0xff]   ;;  %v3809_v46 = vld [vmem:[#allocation4 + $0x88] ss:$16 sps:$4 sm:$0xff]   ;;  %v3818_v51 = vld [vmem:[#allocation4 + $0xc0] ss:$16 sps:$4 sm:$0xff]  }
  0x57   :  { %v3817_v47 = vld [vmem:[#allocation4 + $0xac] ss:$16 sps:$4 sm:$0xff]   ;;  %v3815_v48 = vld [vmem:[#allocation4 + $0xa8] ss:$16 sps:$4 sm:$0xff]   ;;  %v3826_v53 = vld [vmem:[#allocation4 + $0xe4] ss:$16 sps:$4 sm:$0xff]   ;;  %529 = vmatprep.mubr.bf16.mxu0 %v4000_v57 }
  0x58   :  { %v3823_v50 = vld [vmem:[#allocation4 + $0xcc] ss:$16 sps:$4 sm:$0xff]   ;;  %v3821_v52 = vld [vmem:[#allocation4 + $0xc8] ss:$16 sps:$4 sm:$0xff]   ;;  %v3824_v55 = vld [vmem:[#allocation4 + $0xe0] ss:$16 sps:$4 sm:$0xff]  }
  0x59   :  { %3714 = vmatpush3.bf16.msra.mxu1 %v3777_v10  ;;  %500 = vmatpush1.bf16.msra.mxu0 %v3788_v19  ;;  %v3829_v54 = vld [vmem:[#allocation4 + $0xec] ss:$16 sps:$4 sm:$0xff]   ;;  %v3827_v56 = vld [vmem:[#allocation4 + $0xe8] ss:$16 sps:$4 sm:$0xff]   ;;  %v591_v58 = vld [vmem:[#allocation6] sm:$0xff] }
  0x5a   :  { %3715 = vmatprep.subr.bf16.mxu1 %v3998_v0  ;;  %501 = vmatprep.subr.bf16.mxu0 %v3796_v20  ;;  %v595_v59 = vld [vmem:[#allocation6 + $0x20] sm:$0xff]  ;;  %v592_v60 = vld [vmem:[#allocation6 + $0x8] sm:$0xff] }
  0x5b   :  { %v3278_v61 = vcombine.low %v591_v58, %v595_v59  ;;  %v3279_v62 = vcombine.high %v591_v58, %v595_v59  ;;  %v596_v63 = vld [vmem:[#allocation6 + $0x28] sm:$0xff]  ;;  %v3237_v2 = vld [vmem:[%s4224_s4] ss:$0 sm:$0xff] }
  0x5c   :  { %v3281_v1 = vcombine.high %v592_v60, %v596_v63  ;;  %v599_v9 = vld [vmem:[#allocation6 + $0x40] sm:$0xff]  ;;  %v608_v20 = vld [vmem:[#allocation6 + $0x88] sm:$0xff] }
  0x5d   :  { %3716 = vmatpush3.bf16.msra.mxu1 %v3778_v11  ;;  %502 = vmatpush1.bf16.msra.mxu0 %v3794_v21  ;;  %v603_v10 = vld [vmem:[#allocation6 + $0x60] sm:$0xff]  ;;  %v600_v11 = vld [vmem:[#allocation6 + $0x48] sm:$0xff] }
  0x5e   :  { %3717 = vmatprep.subr.bf16.mxu1 %v3998_v0  ;;  %503 = vmatprep.subr.bf16.mxu0 %v3802_v22  ;;  %v3287_v16 = vcombine.high %v599_v9, %v603_v10  ;;  %v607_v18 = vld [vmem:[#allocation6 + $0x80] sm:$0xff]  ;;  %v612_v21 = vld [vmem:[#allocation6 + $0xa8] sm:$0xff]  ;;  %v3286_v22 = vcombine.low %v599_v9, %v603_v10 }
  0x5f   :  { %v611_v19 = vld [vmem:[#allocation6 + $0xa0] sm:$0xff] }
  0x60   :  { %v647_v58 = vld [vmem:[#allocation6 + $0x1c0] sm:$0xff] }
  0x61   :  { %3718 = vmatpush3.bf16.msra.mxu1 %v3779_v12  ;;  %504 = vmatpush1.bf16.msra.mxu0 %v3800_v23  ;;  %v604_v12 = vld [vmem:[#allocation6 + $0x68] sm:$0xff]  ;;  %v651_v59 = vld [vmem:[#allocation6 + $0x1e0] sm:$0xff] }
  0x62   :  { %3719 = vmatprep.subr.bf16.mxu1 %v3998_v0  ;;  %505 = vmatprep.subr.bf16.mxu0 %v3808_v24  ;;  %v3288_v23 = vcombine.low %v600_v11, %v604_v12  ;;  %v3295_v24 = vcombine.high %v607_v18, %v611_v19  ;;  %v663_v10 = vld [vmem:[#allocation6 + $0x240] sm:$0xff] }
  0x65   :  { %3720 = vmatpush3.bf16.msra.mxu1 %v3780_v13  ;;  %506 = vmatpush1.bf16.msra.mxu0 %v3806_v25  ;;  %v3297_v25 = vcombine.high %v608_v20, %v612_v21 }
  0x66   :  { %3721 = vmatprep.subr.bf16.mxu1 %v3998_v0  ;;  %507 = vmatprep.subr.bf16.mxu0 %v3814_v26  ;;  %v3280_v0 = vcombine.low %v592_v60, %v596_v63  ;;  %v615_v26 = vld [vmem:[#allocation6 + $0xc0] sm:$0xff]  ;;  %v648_v60 = vld [vmem:[#allocation6 + $0x1c8] sm:$0xff] }
  0x69   :  { %3722 = vmatpush3.bf16.msra.mxu1 %v3781_v14  ;;  %508 = vmatpush1.bf16.msra.mxu0 %v3812_v27  ;;  %v619_v27 = vld [vmem:[#allocation6 + $0xe0] sm:$0xff] }
  0x6a   :  { %540 = vmatprep.subr.bf16.mxu1 %v3787_v17  ;;  %509 = vmatprep.subr.bf16.mxu0 %v3820_v49  ;;  %v3289_v17 = vcombine.high %v600_v11, %v604_v12  ;;  %v667_v11 = vld [vmem:[#allocation6 + $0x260] sm:$0xff]  ;;  %v664_v12 = vld [vmem:[#allocation6 + $0x248] sm:$0xff] }
  0x6d   :  { %510 = vmatpush1.bf16.msra.mxu0 %v3818_v51  ;;  %v643_v51 = vld [vmem:[#allocation6 + $0x1a0] sm:$0xff] }
  0x6e   :  { %511 = vmatprep.subr.bf16.mxu0 %v3826_v53  ;;  %v644_v53 = vld [vmem:[#allocation6 + $0x1a8] sm:$0xff] }
  0x71   :  { %512 = vmatpush1.bf16.msra.mxu0 %v3824_v55 }
  0x72   :  { %2173 = vmatprep.subr.bf16.mxu0 %v3279_v62 }
 0x127   :  { %v158_v29 = vpop.f32.mrb[0].mxu0 }
 0x128   :  { %v159_v30 = vadd.f32 %v3233_v28, %v158_v29  ;;  %v3705_v31 = vpop.f32.mrb[1].mxu0  ;;  %v620_v29 = vld [vmem:[#allocation6 + $0xe8] sm:$0xff] }
 0x129   :  { %v161_v32 = vpop.f32.mrb[2].mxu0  ;;  %v3296_v31 = vcombine.low %v608_v20, %v612_v21  ;;  %v672_v20 = vld [vmem:[#allocation6 + $0x288] sm:$0xff] }
 0x12a   :  { %v162_v33 = vadd.f32 %v3233_v28, %v161_v32  ;;  %v3706_v34 = vpop.f32.mrb[3].mxu0  ;;  %v165_v35 = vmax.f32 %v159_v30, 0.0  ;;  %v616_v28 = vld [vmem:[#allocation6 + $0xc8] sm:$0xff]  ;;  %v3294_v30 = vcombine.low %v607_v18, %v611_v19  ;;  %v3303_v32 = vcombine.high %v615_v26, %v619_v27  ;;  %v671_v18 = vld [vmem:[#allocation6 + $0x280] sm:$0xff] }
 0x12b   :  { %v623_v34 = vld [vmem:[#allocation6 + $0x100] sm:$0xff]  ;;  %v676_v21 = vld [vmem:[#allocation6 + $0x2a8] sm:$0xff] }
 0x12c   :  { %v166_v36 = vmax.f32 %v162_v33, 0.0  ;;  %v3305_v33 = vcombine.high %v616_v28, %v620_v29  ;;  %v675_v19 = vld [vmem:[#allocation6 + $0x2a0] sm:$0xff] }
 0x12e   :  { %v184_v38 = vpack.c.bf16 %v166_v36, %v165_v35  ;;  %v627_v35 = vld [vmem:[#allocation6 + $0x120] sm:$0xff]  ;;  %v624_v36 = vld [vmem:[#allocation6 + $0x108] sm:$0xff] }
 0x130   :  { %3724 = vmatmul.mubr.bf16.vlgmr.msra.gmra.mrb[0].mxu1 %v184_v38  ;;  %v3302_v38 = vcombine.low %v615_v26, %v619_v27  ;;  %v679_v26 = vld [vmem:[#allocation6 + $0x2c0] sm:$0xff] }
 0x131   :  { %541 = vmatpush1.bf16.msra.mxu1 %v3785_v37  ;;  %572 = vmatprep.mubr.bf16.mxu1 %v4000_v57  ;;  %v628_v37 = vld [vmem:[#allocation6 + $0x128] sm:$0xff]  ;;  %v683_v27 = vld [vmem:[#allocation6 + $0x2e0] sm:$0xff] }
 0x132   :  { %542 = vmatprep.subr.bf16.mxu1 %v3793_v39  ;;  %v3304_v39 = vcombine.low %v616_v28, %v620_v29  ;;  %v680_v28 = vld [vmem:[#allocation6 + $0x2c8] sm:$0xff] }
 0x133   :  { %v684_v29 = vld [vmem:[#allocation6 + $0x2e8] sm:$0xff] }
 0x135   :  { %543 = vmatpush1.bf16.msra.mxu1 %v3791_v40  ;;  %v3311_v40 = vcombine.high %v623_v34, %v627_v35 }
 0x136   :  { %544 = vmatprep.subr.bf16.mxu1 %v3799_v41  ;;  %v3313_v41 = vcombine.high %v624_v36, %v628_v37 }
 0x139   :  { %545 = vmatpush1.bf16.msra.mxu1 %v3797_v42  ;;  %v631_v42 = vld [vmem:[#allocation6 + $0x140] sm:$0xff] }
 0x13a   :  { %546 = vmatprep.subr.bf16.mxu1 %v3805_v43  ;;  %v635_v43 = vld [vmem:[#allocation6 + $0x160] sm:$0xff] }
 0x13d   :  { %547 = vmatpush1.bf16.msra.mxu1 %v3803_v44  ;;  %v632_v44 = vld [vmem:[#allocation6 + $0x148] sm:$0xff] }
 0x13e   :  { %548 = vmatprep.subr.bf16.mxu1 %v3811_v45  ;;  %v636_v45 = vld [vmem:[#allocation6 + $0x168] sm:$0xff] }
 0x13f   :  { %v3321_v49 = vcombine.high %v632_v44, %v636_v45  ;;  %v3320_v55 = vcombine.low %v632_v44, %v636_v45  ;;  %v696_v44 = vld [vmem:[#allocation6 + $0x348] sm:$0xff] }
 0x140   :  { %v700_v45 = vld [vmem:[#allocation6 + $0x368] sm:$0xff] }
 0x141   :  { %549 = vmatpush1.bf16.msra.mxu1 %v3809_v46  ;;  %v3310_v46 = vcombine.low %v623_v34, %v627_v35  ;;  %v687_v34 = vld [vmem:[#allocation6 + $0x300] sm:$0xff] }
 0x142   :  { %550 = vmatprep.subr.bf16.mxu1 %v3817_v47  ;;  %v3312_v47 = vcombine.low %v624_v36, %v628_v37  ;;  %v691_v35 = vld [vmem:[#allocation6 + $0x320] sm:$0xff]  ;;  %v688_v36 = vld [vmem:[#allocation6 + $0x308] sm:$0xff] }
 0x143   :  { %v692_v37 = vld [vmem:[#allocation6 + $0x328] sm:$0xff] }
 0x145   :  { %551 = vmatpush1.bf16.msra.mxu1 %v3815_v48  ;;  %v3319_v48 = vcombine.high %v631_v42, %v635_v43 }
 0x146   :  { %552 = vmatprep.subr.bf16.mxu1 %v3823_v50  ;;  %v639_v50 = vld [vmem:[#allocation6 + $0x180] sm:$0xff] }
 0x147   :  { %v3326_v62 = vcombine.low %v639_v50, %v643_v51 }
 0x149   :  { %553 = vmatpush1.bf16.msra.mxu1 %v3821_v52  ;;  %v640_v52 = vld [vmem:[#allocation6 + $0x188] sm:$0xff] }
 0x14a   :  { %554 = vmatprep.subr.bf16.mxu1 %v3829_v54  ;;  %v3318_v54 = vcombine.low %v631_v42, %v635_v43  ;;  %v3329_v57 = vcombine.high %v640_v52, %v644_v53  ;;  %v3328_v63 = vcombine.low %v640_v52, %v644_v53  ;;  %v695_v42 = vld [vmem:[#allocation6 + $0x340] sm:$0xff] }
 0x14b   :  { %v699_v43 = vld [vmem:[#allocation6 + $0x360] sm:$0xff] }
 0x14c   :  { %v703_v52 = vld [vmem:[#allocation6 + $0x380] sm:$0xff] }
 0x14d   :  { %555 = vmatpush1.bf16.msra.mxu1 %v3827_v56  ;;  %v3327_v56 = vcombine.high %v639_v50, %v643_v51  ;;  %v3382_v50 = vcombine.low %v695_v42, %v699_v43  ;;  %v3384_v51 = vcombine.low %v696_v44, %v700_v45  ;;  %v707_v53 = vld [vmem:[#allocation6 + $0x3a0] sm:$0xff] }
 0x14e   :  { %2259 = vmatprep.subr.bf16.mxu1 %v3281_v1 }
 0x203   :  { %v273_v3 = vpop.f32.mrb[0].mxu1 }
 0x204   :  { %v274_v4 = vadd.f32 %v3237_v2, %v273_v3  ;;  %v3725_v5 = vpop.f32.mrb[1].mxu1  ;;  %v659_v3 = vld [vmem:[#allocation6 + $0x220] sm:$0xff] }
 0x205   :  { %v276_v6 = vpop.f32.mrb[2].mxu1  ;;  %v660_v5 = vld [vmem:[#allocation6 + $0x228] sm:$0xff] }
 0x206   :  { %v277_v7 = vadd.f32 %v3237_v2, %v276_v6  ;;  %v3726_v8 = vpop.f32.mrb[3].mxu1  ;;  %v280_v13 = vmax.f32 %v274_v4, 0.0  ;;  %v655_v2 = vld [vmem:[#allocation6 + $0x200] sm:$0xff]  ;;  %v656_v4 = vld [vmem:[#allocation6 + $0x208] sm:$0xff]  ;;  %v3334_v6 = vcombine.low %v647_v58, %v651_v59 }
 0x207   :  { %v3343_v8 = vcombine.high %v655_v2, %v659_v3  ;;  %v3345_v9 = vcombine.high %v656_v4, %v660_v5 }
 0x208   :  { %v281_v14 = vmax.f32 %v277_v7, 0.0 }
 0x20a   :  { %v315_v15 = vpack.c.bf16 %v281_v14, %v280_v13  ;;  %v668_v13 = vld [vmem:[#allocation6 + $0x268] sm:$0xff]  ;;  %v3342_v14 = vcombine.low %v655_v2, %v659_v3 }
 0x20c   :  { %530 = vmatmul.mubr.bf16.vlgmr.msra.gmra.mrb[4].mxu0 %v315_v15  ;;  %573 = vmatmul.mubr.bf16.vlgmr.msra.gmra.mrb[4].mxu1 %v315_v15  ;;  %v3344_v15 = vcombine.low %v656_v4, %v660_v5  ;;  %v4133_v4 = vld [vmem:[#allocation6 + $0x400] sm:$0xff] }
 0x20d   :  { %2174 = vmatpush1.bf16.msra.mxu0 %v3278_v61  ;;  %2260 = vmatpush1.bf16.msra.mxu1 %v3280_v0  ;;  %v652_v61 = vld [vmem:[#allocation6 + $0x1e8] sm:$0xff]  ;;  %v3335_v0 = vcombine.high %v647_v58, %v651_v59  ;;  %v4135_v5 = vld [vmem:[#allocation6 + $0x420] sm:$0xff] }
 0x20e   :  { %2175 = vmatprep.subr.bf16.mxu0 %v3287_v16  ;;  %2261 = vmatprep.subr.bf16.mxu1 %v3289_v17  ;;  %v3337_v1 = vcombine.high %v648_v60, %v652_v61  ;;  %v3336_v7 = vcombine.low %v648_v60, %v652_v61  ;;  %v3351_v16 = vcombine.high %v663_v10, %v667_v11  ;;  %v711_v60 = vld [vmem:[#allocation6 + $0x3c0] sm:$0xff] }
 0x20f   :  { %v3353_v17 = vcombine.high %v664_v12, %v668_v13  ;;  %v715_v61 = vld [vmem:[#allocation6 + $0x3e0] sm:$0xff] }
 0x211   :  { %2176 = vmatpush1.bf16.msra.mxu0 %v3286_v22  ;;  %2262 = vmatpush1.bf16.msra.mxu1 %v3288_v23  ;;  %v3350_v22 = vcombine.low %v663_v10, %v667_v11  ;;  %v3352_v23 = vcombine.low %v664_v12, %v668_v13  ;;  %v317_v12 = vlaneseq }
 0x212   :  { %2177 = vmatprep.subr.bf16.mxu0 %v3295_v24  ;;  %2263 = vmatprep.subr.bf16.mxu1 %v3297_v25  ;;  %v3359_v24 = vcombine.high %v671_v18, %v675_v19  ;;  %v3361_v25 = vcombine.high %v672_v20, %v676_v21 }
 0x213   :  { %v4145_v13 = vshrl.u32 %v317_v12, 7  ;;  %v756_v12 = vld [vmem:[#allocation6 + $0x528] sm:$0xff] }
 0x215   :  { %2178 = vmatpush1.bf16.msra.mxu0 %v3294_v30  ;;  %2264 = vmatpush1.bf16.msra.mxu1 %v3296_v31  ;;  %v3358_v30 = vcombine.low %v671_v18, %v675_v19  ;;  %v3360_v31 = vcombine.low %v672_v20, %v676_v21  ;;  %v331_v18 = vsub.s32 3, %v4145_v13 }
 0x216   :  { %2179 = vmatprep.subr.bf16.mxu0 %v3303_v32  ;;  %2265 = vmatprep.subr.bf16.mxu1 %v3305_v33  ;;  %v3367_v32 = vcombine.high %v679_v26, %v683_v27  ;;  %v3369_v33 = vcombine.high %v680_v28, %v684_v29 }
 0x219   :  { %2180 = vmatpush1.bf16.msra.mxu0 %v3302_v38  ;;  %2266 = vmatpush1.bf16.msra.mxu1 %v3304_v39  ;;  %v3366_v38 = vcombine.low %v679_v26, %v683_v27  ;;  %v3368_v39 = vcombine.low %v680_v28, %v684_v29 }
 0x21a   :  { %2181 = vmatprep.subr.bf16.mxu0 %v3311_v40  ;;  %2267 = vmatprep.subr.bf16.mxu1 %v3313_v41  ;;  %v3375_v40 = vcombine.high %v687_v34, %v691_v35  ;;  %v3377_v41 = vcombine.high %v688_v36, %v692_v37 }
 0x21d   :  { %2182 = vmatpush1.bf16.msra.mxu0 %v3310_v46  ;;  %2268 = vmatpush1.bf16.msra.mxu1 %v3312_v47  ;;  %v3374_v46 = vcombine.low %v687_v34, %v691_v35  ;;  %v3376_v47 = vcombine.low %v688_v36, %v692_v37 }
 0x21e   :  { %2183 = vmatprep.subr.bf16.mxu0 %v3319_v48  ;;  %2269 = vmatprep.subr.bf16.mxu1 %v3321_v49  ;;  %v3383_v48 = vcombine.high %v695_v42, %v699_v43  ;;  %v3385_v49 = vcombine.high %v696_v44, %v700_v45 }
 0x221   :  { %2184 = vmatpush1.bf16.msra.mxu0 %v3318_v54  ;;  %2270 = vmatpush1.bf16.msra.mxu1 %v3320_v55  ;;  %v704_v54 = vld [vmem:[#allocation6 + $0x388] sm:$0xff]  ;;  %v3391_v55 = vcombine.high %v703_v52, %v707_v53 }
 0x222   :  { %2185 = vmatprep.subr.bf16.mxu0 %v3327_v56  ;;  %2271 = vmatprep.subr.bf16.mxu1 %v3329_v57  ;;  %v708_v56 = vld [vmem:[#allocation6 + $0x3a8] sm:$0xff]  ;;  %v3390_v57 = vcombine.low %v703_v52, %v707_v53 }
 0x223   :  { %v3392_v58 = vcombine.low %v704_v54, %v708_v56  ;;  %v3393_v59 = vcombine.high %v704_v54, %v708_v56  ;;  %v732_v52 = vld [vmem:[#allocation6 + $0x468] sm:$0xff] }
 0x225   :  { %2186 = vmatpush1.bf16.msra.mxu0 %v3326_v62  ;;  %2272 = vmatpush1.bf16.msra.mxu1 %v3328_v63  ;;  %v712_v62 = vld [vmem:[#allocation6 + $0x3c8] sm:$0xff]  ;;  %v3399_v63 = vcombine.high %v711_v60, %v715_v61 }
 0x226   :  { %2187 = vmatprep.subr.bf16.mxu0 %v3335_v0  ;;  %2273 = vmatprep.subr.bf16.mxu1 %v3337_v1  ;;  %v716_v0 = vld [vmem:[#allocation6 + $0x3e8] sm:$0xff]  ;;  %v3398_v1 = vcombine.low %v711_v60, %v715_v61 }
 0x227   :  { %v3400_v2 = vcombine.low %v712_v62, %v716_v0  ;;  %v3401_v3 = vcombine.high %v712_v62, %v716_v0  ;;  %v740_v60 = vld [vmem:[#allocation6 + $0x4a8] sm:$0xff] }
 0x229   :  { %2188 = vmatpush1.bf16.msra.mxu0 %v3334_v6  ;;  %2274 = vmatpush1.bf16.msra.mxu1 %v3336_v7  ;;  %v4137_v6 = vld [vmem:[#allocation6 + $0x408] sm:$0xff]  ;;  %v3407_v7 = vcombine.high %v4133_v4, %v4135_v5 }
 0x22a   :  { %2189 = vmatprep.subr.bf16.mxu0 %v3343_v8  ;;  %2275 = vmatprep.subr.bf16.mxu1 %v3345_v9  ;;  %v724_v8 = vld [vmem:[#allocation6 + $0x428] sm:$0xff]  ;;  %v3406_v9 = vcombine.low %v4133_v4, %v4135_v5 }
 0x22b   :  { %v3408_v10 = vcombine.low %v4137_v6, %v724_v8  ;;  %v3409_v11 = vcombine.high %v4137_v6, %v724_v8  ;;  %v748_v4 = vld [vmem:[#allocation6 + $0x4e8] sm:$0xff] }
 0x22d   :  { %2190 = vmatpush1.bf16.msra.mxu0 %v3342_v14  ;;  %2276 = vmatpush1.bf16.msra.mxu1 %v3344_v15  ;;  %v319_v14 = vsub.s32 0, %v4145_v13  ;;  %v327_v15 = vsub.s32 2, %v4145_v13 }
 0x22e   :  { %2191 = vmatprep.subr.bf16.mxu0 %v3351_v16  ;;  %2277 = vmatprep.subr.bf16.mxu1 %v3353_v17  ;;  %v314_v16 = vld [vmem:[%s4226_s6] sm:$0xf]  ;;  %v323_v17 = vsub.s32 1, %v4145_v13 }
 0x22f   :  { %v320_v19 = vrot.slane %v314_v16, %v319_v14  ;;  %v328_v20 = vrot.slane %v314_v16, %v327_v15 }
 0x230   :  { %v324_v21 = vrot.slane %v314_v16, %v323_v17 }
 0x231   :  { %2192 = vmatpush1.bf16.msra.mxu0 %v3350_v22  ;;  %2278 = vmatpush1.bf16.msra.mxu1 %v3352_v23  ;;  %v332_v22 = vrot.slane %v314_v16, %v331_v18 }
 0x232   :  { %2193 = vmatprep.subr.bf16.mxu0 %v3359_v24  ;;  %2279 = vmatprep.subr.bf16.mxu1 %v3361_v25 }
 0x235   :  { %2194 = vmatpush1.bf16.msra.mxu0 %v3358_v30  ;;  %2280 = vmatpush1.bf16.msra.mxu1 %v3360_v31 }
 0x236   :  { %2195 = vmatprep.subr.bf16.mxu0 %v3367_v32  ;;  %2281 = vmatprep.subr.bf16.mxu1 %v3369_v33 }
 0x239   :  { %2196 = vmatpush1.bf16.msra.mxu0 %v3366_v38  ;;  %2282 = vmatpush1.bf16.msra.mxu1 %v3368_v39 }
 0x23a   :  { %2197 = vmatprep.subr.bf16.mxu0 %v3375_v40  ;;  %2283 = vmatprep.subr.bf16.mxu1 %v3377_v41 }
 0x23d   :  { %2198 = vmatpush1.bf16.msra.mxu0 %v3374_v46  ;;  %2284 = vmatpush1.bf16.msra.mxu1 %v3376_v47  ;;  %v727_v47 = vld [vmem:[#allocation6 + $0x440] sm:$0xff] }
 0x23e   :  { %2199 = vmatprep.subr.bf16.mxu0 %v3383_v48  ;;  %2285 = vmatprep.subr.bf16.mxu1 %v3385_v49 }
 0x241   :  { %2200 = vmatpush1.bf16.msra.mxu0 %v3382_v50  ;;  %2286 = vmatpush1.bf16.msra.mxu1 %v3384_v51  ;;  %v731_v50 = vld [vmem:[#allocation6 + $0x460] sm:$0xff]  ;;  %v728_v51 = vld [vmem:[#allocation6 + $0x448] sm:$0xff] }
 0x242   :  { %2201 = vmatprep.subr.bf16.mxu0 %v3391_v55  ;;  %2287 = vmatprep.subr.bf16.mxu1 %v3393_v59  ;;  %v735_v55 = vld [vmem:[#allocation6 + $0x480] sm:$0xff]  ;;  %v3415_v56 = vcombine.high %v727_v47, %v731_v50  ;;  %v736_v59 = vld [vmem:[#allocation6 + $0x488] sm:$0xff]  ;;  %v3414_v61 = vcombine.low %v727_v47, %v731_v50  ;;  %v3416_v62 = vcombine.low %v728_v51, %v732_v52 }
 0x243   :  { %v3425_v0 = vcombine.high %v736_v59, %v740_v60  ;;  %v3424_v6 = vcombine.low %v736_v59, %v740_v60  ;;  %v787_v47 = vld [vmem:[#allocation6 + $0x620] sm:$0xff]  ;;  %v784_v50 = vld [vmem:[#allocation6 + $0x608] sm:$0xff] }
 0x244   :  { %v795_v59 = vld [vmem:[#allocation6 + $0x660] sm:$0xff]  ;;  %v792_v60 = vld [vmem:[#allocation6 + $0x648] sm:$0xff] }
 0x245   :  { %2202 = vmatpush1.bf16.msra.mxu0 %v3390_v57  ;;  %2288 = vmatpush1.bf16.msra.mxu1 %v3392_v58  ;;  %v3417_v57 = vcombine.high %v728_v51, %v732_v52  ;;  %v739_v58 = vld [vmem:[#allocation6 + $0x4a0] sm:$0xff]  ;;  %v788_v51 = vld [vmem:[#allocation6 + $0x628] sm:$0xff] }
 0x246   :  { %2203 = vmatprep.subr.bf16.mxu0 %v3399_v63  ;;  %2289 = vmatprep.subr.bf16.mxu1 %v3401_v3  ;;  %v3423_v63 = vcombine.high %v735_v55, %v739_v58  ;;  %v744_v3 = vld [vmem:[#allocation6 + $0x4c8] sm:$0xff]  ;;  %v3422_v5 = vcombine.low %v735_v55, %v739_v58  ;;  %v791_v58 = vld [vmem:[#allocation6 + $0x640] sm:$0xff] }
 0x247   :  { %v3433_v8 = vcombine.high %v744_v3, %v748_v4 }
 0x249   :  { %2204 = vmatpush1.bf16.msra.mxu0 %v3398_v1  ;;  %2290 = vmatpush1.bf16.msra.mxu1 %v3400_v2  ;;  %v743_v1 = vld [vmem:[#allocation6 + $0x4c0] sm:$0xff] }
 0x24a   :  { %2216 = vmatprep.subr.bf16.mxu0 %v3407_v7  ;;  %2302 = vmatprep.subr.bf16.mxu1 %v3409_v11  ;;  %v747_v2 = vld [vmem:[#allocation6 + $0x4e0] sm:$0xff]  ;;  %v752_v11 = vld [vmem:[#allocation6 + $0x508] sm:$0xff] }
 0x24b   :  { %v3431_v7 = vcombine.high %v743_v1, %v747_v2  ;;  %v3430_v16 = vcombine.low %v743_v1, %v747_v2  ;;  %v799_v2 = vld [vmem:[#allocation6 + $0x680] sm:$0xff] }
 0x2df   :  { %v531_v23 = vpop.f32.mrb[4].mxu0  ;;  %v574_v24 = vpop.f32.mrb[4].mxu1 }
 0x2e0   :  { %v532_v25 = vadd.f32 %v531_v23, %v320_v19  ;;  %v575_v26 = vadd.f32 %v574_v24, %v328_v20  ;;  %v533_v27 = vpop.f32.mrb[5].mxu0  ;;  %v576_v28 = vpop.f32.mrb[5].mxu1  ;;  %v763_v23 = vld [vmem:[#allocation6 + $0x560] sm:$0xff]  ;;  %v760_v24 = vld [vmem:[#allocation6 + $0x548] sm:$0xff] }
 0x2e1   :  { %v534_v29 = vadd.f32 %v533_v27, %v324_v21  ;;  %v577_v30 = vadd.f32 %v576_v28, %v332_v22  ;;  %v535_v31 = vpop.f32.mrb[6].mxu0  ;;  %v578_v32 = vpop.f32.mrb[6].mxu1  ;;  %v3440_v27 = vcombine.low %v752_v11, %v756_v12 }
 0x2e2   :  { %v536_v33 = vadd.f32 %v535_v31, %v320_v19  ;;  %v579_v34 = vadd.f32 %v578_v32, %v328_v20  ;;  %v537_v35 = vpop.f32.mrb[7].mxu0  ;;  %v580_v36 = vpop.f32.mrb[7].mxu1  ;;  %v583_v39 = vmax.f32 %v532_v25, 0.0  ;;  %v585_v40 = vmax.f32 %v575_v26, 0.0  ;;  %v764_v25 = vld [vmem:[#allocation6 + $0x568] sm:$0xff]  ;;  %v771_v31 = vld [vmem:[#allocation6 + $0x5a0] sm:$0xff] }
 0x2e3   :  { %v538_v37 = vadd.f32 %v537_v35, %v324_v21  ;;  %v581_v38 = vadd.f32 %v580_v36, %v332_v22  ;;  %v584_v43 = vmax.f32 %v534_v29, 0.0  ;;  %v586_v44 = vmax.f32 %v577_v30, 0.0  ;;  %v759_v22 = vld [vmem:[#allocation6 + $0x540] sm:$0xff]  ;;  %v768_v32 = vld [vmem:[#allocation6 + $0x588] sm:$0xff] }
 0x2e4   :  { %v587_v41 = vmax.f32 %v536_v33, 0.0  ;;  %v589_v42 = vmax.f32 %v579_v34, 0.0  ;;  %v3432_v19 = vcombine.low %v744_v3, %v748_v4  ;;  %v3441_v21 = vcombine.high %v752_v11, %v756_v12  ;;  %v767_v30 = vld [vmem:[#allocation6 + $0x580] sm:$0xff]  ;;  %v772_v33 = vld [vmem:[#allocation6 + $0x5a8] sm:$0xff] }
 0x2e5   :  { %v588_v45 = vmax.f32 %v538_v37, 0.0  ;;  %v590_v46 = vmax.f32 %v581_v38, 0.0  ;;  %v3447_v28 = vcombine.high %v759_v22, %v763_v23  ;;  %v3449_v29 = vcombine.high %v760_v24, %v764_v25  ;;  %v775_v38 = vld [vmem:[#allocation6 + $0x5c0] sm:$0xff]  ;;  %v800_v4 = vld [vmem:[#allocation6 + $0x688] sm:$0xff] }
 0x2e6   :  { %v4162_v48 = vpack.c.bf16 %v587_v41, %v583_v39  ;;  %v4164_v49 = vpack.c.bf16 %v589_v42, %v585_v40  ;;  %v3446_v34 = vcombine.low %v759_v22, %v763_v23  ;;  %v3448_v35 = vcombine.low %v760_v24, %v764_v25  ;;  %v779_v39 = vld [vmem:[#allocation6 + $0x5e0] sm:$0xff]  ;;  %v776_v40 = vld [vmem:[#allocation6 + $0x5c8] sm:$0xff] }
 0x2e7   :  { %v4166_v53 = vpack.c.bf16 %v588_v45, %v584_v43  ;;  %v4168_v54 = vpack.c.bf16 %v590_v46, %v586_v44  ;;  %v3455_v36 = vcombine.high %v767_v30, %v771_v31  ;;  %v3457_v37 = vcombine.high %v768_v32, %v772_v33  ;;  %v780_v41 = vld [vmem:[#allocation6 + $0x5e8] sm:$0xff]  ;;  %v783_v46 = vld [vmem:[#allocation6 + $0x600] sm:$0xff] }
 0x2e8   :  { %v3454_v42 = vcombine.low %v767_v30, %v771_v31  ;;  %v3456_v43 = vcombine.low %v768_v32, %v772_v33  ;;  %v3463_v44 = vcombine.high %v775_v38, %v779_v39  ;;  %v3465_v45 = vcombine.high %v776_v40, %v780_v41  ;;  %v803_v3 = vld [vmem:[#allocation6 + $0x6a0] sm:$0xff]  ;;  %v808_v12 = vld [vmem:[#allocation6 + $0x6c8] sm:$0xff] }
 0x2e9   :  { %2205 = vmatprep.mubr.bf16.mxu0 %v4166_v53  ;;  %2291 = vmatprep.mubr.bf16.mxu1 %v4166_v53  ;;  %v3462_v52 = vcombine.low %v775_v38, %v779_v39  ;;  %v3464_v55 = vcombine.low %v776_v40, %v780_v41  ;;  %v811_v11 = vld [vmem:[#allocation6 + $0x6e0] sm:$0xff]  ;;  %v816_v25 = vld [vmem:[#allocation6 + $0x708] sm:$0xff] }
 0x2ea   :  { %2206 = vmatmul.mubr.bf16.vlgmr.msra.gmra.mrb[8].mxu0 %v4162_v48  ;;  %2292 = vmatmul.mubr.bf16.vlgmr.msra.gmra.mrb[8].mxu1 %v4162_v48  ;;  %v815_v23 = vld [vmem:[#allocation6 + $0x700] sm:$0xff]  ;;  %v824_v33 = vld [vmem:[#allocation6 + $0x748] sm:$0xff] }
 0x2eb   :  { %2217 = vmatpush1.bf16.msra.mxu0 %v3406_v9  ;;  %2303 = vmatpush1.bf16.msra.mxu1 %v3408_v10  ;;  %v751_v9 = vld [vmem:[#allocation6 + $0x500] sm:$0xff]  ;;  %v832_v41 = vld [vmem:[#allocation6 + $0x788] sm:$0xff] }
 0x2ec   :  { %2248 = vmatprep.mubr.bf16.mxu0 %v4168_v54  ;;  %2334 = vmatprep.mubr.bf16.mxu1 %v4168_v54  ;;  %v755_v10 = vld [vmem:[#allocation6 + $0x520] sm:$0xff] }
 0x2ed   :  { %2218 = vmatprep.subr.bf16.mxu0 %v3415_v56  ;;  %2304 = vmatprep.subr.bf16.mxu1 %v3417_v57  ;;  %v3439_v20 = vcombine.high %v751_v9, %v755_v10  ;;  %v3438_v26 = vcombine.low %v751_v9, %v755_v10  ;;  %v3471_v56 = vcombine.high %v783_v46, %v787_v47  ;;  %v807_v10 = vld [vmem:[#allocation6 + $0x6c0] sm:$0xff] }
 0x2ee   :  { %v3473_v57 = vcombine.high %v784_v50, %v788_v51  ;;  %v819_v24 = vld [vmem:[#allocation6 + $0x720] sm:$0xff] }
 0x2ef   :  { %2219 = vmatpush1.bf16.msra.mxu0 %v3414_v61  ;;  %2305 = vmatpush1.bf16.msra.mxu1 %v3416_v62  ;;  %v796_v61 = vld [vmem:[#allocation6 + $0x668] sm:$0xff]  ;;  %v3470_v62 = vcombine.low %v783_v46, %v787_v47  ;;  %v823_v31 = vld [vmem:[#allocation6 + $0x740] sm:$0xff] }
 0x2f0   :  { %2220 = vmatprep.subr.bf16.mxu0 %v3423_v63  ;;  %2306 = vmatprep.subr.bf16.mxu1 %v3425_v0  ;;  %v3472_v63 = vcombine.low %v784_v50, %v788_v51  ;;  %v3479_v0 = vcombine.high %v791_v58, %v795_v59  ;;  %v3481_v1 = vcombine.high %v792_v60, %v796_v61  ;;  %v827_v32 = vld [vmem:[#allocation6 + $0x760] sm:$0xff]  ;;  %v840_v51 = vld [vmem:[#allocation6 + $0x7c8] sm:$0xff] }
 0x2f1   :  { %v831_v39 = vld [vmem:[#allocation6 + $0x780] sm:$0xff] }
 0x2f2   :  { %v835_v40 = vld [vmem:[#allocation6 + $0x7a0] sm:$0xff] }
 0x2f3   :  { %2221 = vmatpush1.bf16.msra.mxu0 %v3422_v5  ;;  %2307 = vmatpush1.bf16.msra.mxu1 %v3424_v6  ;;  %v804_v5 = vld [vmem:[#allocation6 + $0x6a8] sm:$0xff]  ;;  %v3478_v6 = vcombine.low %v791_v58, %v795_v59  ;;  %v839_v47 = vld [vmem:[#allocation6 + $0x7c0] sm:$0xff]  ;;  %v593_v59 = vld [vmem:[#allocation6 + $0x10] sm:$0xff] }
 0x2f4   :  { %2222 = vmatprep.subr.bf16.mxu0 %v3431_v7  ;;  %2308 = vmatprep.subr.bf16.mxu1 %v3433_v8  ;;  %v3480_v7 = vcombine.low %v792_v60, %v796_v61  ;;  %v3487_v8 = vcombine.high %v799_v2, %v803_v3  ;;  %v3489_v9 = vcombine.high %v800_v4, %v804_v5  ;;  %v843_v50 = vld [vmem:[#allocation6 + $0x7e0] sm:$0xff]  ;;  %v597_v60 = vld [vmem:[#allocation6 + $0x30] sm:$0xff]  ;;  %v594_v61 = vld [vmem:[#allocation6 + $0x18] sm:$0xff] }
 0x2f7   :  { %2223 = vmatpush1.bf16.msra.mxu0 %v3430_v16  ;;  %2309 = vmatpush1.bf16.msra.mxu1 %v3432_v19  ;;  %v812_v16 = vld [vmem:[#allocation6 + $0x6e8] sm:$0xff]  ;;  %v3486_v19 = vcombine.low %v799_v2, %v803_v3  ;;  %v601_v3 = vld [vmem:[#allocation6 + $0x50] sm:$0xff] }
 0x2f8   :  { %2224 = vmatprep.subr.bf16.mxu0 %v3439_v20  ;;  %2310 = vmatprep.subr.bf16.mxu1 %v3441_v21  ;;  %v3488_v20 = vcombine.low %v800_v4, %v804_v5  ;;  %v3495_v21 = vcombine.high %v807_v10, %v811_v11  ;;  %v3497_v22 = vcombine.high %v808_v12, %v812_v16  ;;  %v605_v4 = vld [vmem:[#allocation6 + $0x70] sm:$0xff]  ;;  %v602_v5 = vld [vmem:[#allocation6 + $0x58] sm:$0xff] }
 0x2fb   :  { %2225 = vmatpush1.bf16.msra.mxu0 %v3438_v26  ;;  %2311 = vmatpush1.bf16.msra.mxu1 %v3440_v27  ;;  %v820_v26 = vld [vmem:[#allocation6 + $0x728] sm:$0xff]  ;;  %v3494_v27 = vcombine.low %v807_v10, %v811_v11  ;;  %v609_v11 = vld [vmem:[#allocation6 + $0x90] sm:$0xff] }
 0x2fc   :  { %2226 = vmatprep.subr.bf16.mxu0 %v3447_v28  ;;  %2312 = vmatprep.subr.bf16.mxu1 %v3449_v29  ;;  %v3496_v28 = vcombine.low %v808_v12, %v812_v16  ;;  %v3503_v29 = vcombine.high %v815_v23, %v819_v24  ;;  %v3505_v30 = vcombine.high %v816_v25, %v820_v26  ;;  %v613_v12 = vld [vmem:[#allocation6 + $0xb0] sm:$0xff]  ;;  %v610_v16 = vld [vmem:[#allocation6 + $0x98] sm:$0xff] }
 0x2ff   :  { %2227 = vmatpush1.bf16.msra.mxu0 %v3446_v34  ;;  %2313 = vmatpush1.bf16.msra.mxu1 %v3448_v35  ;;  %v828_v34 = vld [vmem:[#allocation6 + $0x768] sm:$0xff]  ;;  %v3502_v35 = vcombine.low %v815_v23, %v819_v24  ;;  %v617_v24 = vld [vmem:[#allocation6 + $0xd0] sm:$0xff] }
 0x300   :  { %2228 = vmatprep.subr.bf16.mxu0 %v3455_v36  ;;  %2314 = vmatprep.subr.bf16.mxu1 %v3457_v37  ;;  %v3504_v36 = vcombine.low %v816_v25, %v820_v26  ;;  %v3511_v37 = vcombine.high %v823_v31, %v827_v32  ;;  %v3513_v38 = vcombine.high %v824_v33, %v828_v34  ;;  %v621_v25 = vld [vmem:[#allocation6 + $0xf0] sm:$0xff]  ;;  %v618_v26 = vld [vmem:[#allocation6 + $0xd8] sm:$0xff] }
 0x303   :  { %2229 = vmatpush1.bf16.msra.mxu0 %v3454_v42  ;;  %2315 = vmatpush1.bf16.msra.mxu1 %v3456_v43  ;;  %v836_v42 = vld [vmem:[#allocation6 + $0x7a8] sm:$0xff]  ;;  %v3510_v43 = vcombine.low %v823_v31, %v827_v32  ;;  %v625_v32 = vld [vmem:[#allocation6 + $0x110] sm:$0xff] }
 0x304   :  { %2230 = vmatprep.subr.bf16.mxu0 %v3463_v44  ;;  %2316 = vmatprep.subr.bf16.mxu1 %v3465_v45  ;;  %v3512_v44 = vcombine.low %v824_v33, %v828_v34  ;;  %v3519_v45 = vcombine.high %v831_v39, %v835_v40  ;;  %v3521_v46 = vcombine.high %v832_v41, %v836_v42  ;;  %v629_v33 = vld [vmem:[#allocation6 + $0x130] sm:$0xff]  ;;  %v630_v34 = vld [vmem:[#allocation6 + $0x138] sm:$0xff] }
 0x307   :  { %2231 = vmatpush1.bf16.msra.mxu0 %v3462_v52  ;;  %2317 = vmatpush1.bf16.msra.mxu1 %v3464_v55  ;;  %v844_v52 = vld [vmem:[#allocation6 + $0x7e8] sm:$0xff]  ;;  %v3518_v55 = vcombine.low %v831_v39, %v835_v40  ;;  %v633_v39 = vld [vmem:[#allocation6 + $0x150] sm:$0xff] }
 0x308   :  { %2232 = vmatprep.subr.bf16.mxu0 %v3471_v56  ;;  %2318 = vmatprep.subr.bf16.mxu1 %v3473_v57  ;;  %v3520_v56 = vcombine.low %v832_v41, %v836_v42  ;;  %v3527_v57 = vcombine.high %v839_v47, %v843_v50  ;;  %v3529_v58 = vcombine.high %v840_v51, %v844_v52  ;;  %v637_v40 = vld [vmem:[#allocation6 + $0x170] sm:$0xff]  ;;  %v634_v41 = vld [vmem:[#allocation6 + $0x158] sm:$0xff] }
 0x309   :  { %v638_v42 = vld [vmem:[#allocation6 + $0x178] sm:$0xff] }
 0x30b   :  { %2233 = vmatpush1.bf16.msra.mxu0 %v3470_v62  ;;  %2319 = vmatpush1.bf16.msra.mxu1 %v3472_v63  ;;  %v598_v62 = vld [vmem:[#allocation6 + $0x38] sm:$0xff]  ;;  %v3526_v63 = vcombine.low %v839_v47, %v843_v50  ;;  %v641_v47 = vld [vmem:[#allocation6 + $0x190] sm:$0xff] }
 0x30c   :  { %2234 = vmatprep.subr.bf16.mxu0 %v3479_v0  ;;  %2320 = vmatprep.subr.bf16.mxu1 %v3481_v1  ;;  %v3528_v0 = vcombine.low %v840_v51, %v844_v52  ;;  %v3283_v1 = vcombine.high %v593_v59, %v597_v60  ;;  %v3285_v2 = vcombine.high %v594_v61, %v598_v62  ;;  %v645_v50 = vld [vmem:[#allocation6 + $0x1b0] sm:$0xff]  ;;  %v642_v51 = vld [vmem:[#allocation6 + $0x198] sm:$0xff] }
 0x30d   :  { %v646_v52 = vld [vmem:[#allocation6 + $0x1b8] sm:$0xff] }
 0x30f   :  { %2235 = vmatpush1.bf16.msra.mxu0 %v3478_v6  ;;  %2321 = vmatpush1.bf16.msra.mxu1 %v3480_v7  ;;  %v606_v6 = vld [vmem:[#allocation6 + $0x78] sm:$0xff]  ;;  %v3282_v7 = vcombine.low %v593_v59, %v597_v60  ;;  %v649_v59 = vld [vmem:[#allocation6 + $0x1d0] sm:$0xff] }
 0x310   :  { %2236 = vmatprep.subr.bf16.mxu0 %v3487_v8  ;;  %2322 = vmatprep.subr.bf16.mxu1 %v3489_v9  ;;  %v3284_v8 = vcombine.low %v594_v61, %v598_v62  ;;  %v3291_v9 = vcombine.high %v601_v3, %v605_v4  ;;  %v3293_v10 = vcombine.high %v602_v5, %v606_v6  ;;  %v653_v60 = vld [vmem:[#allocation6 + $0x1f0] sm:$0xff]  ;;  %v650_v61 = vld [vmem:[#allocation6 + $0x1d8] sm:$0xff] }
 0x311   :  { %v654_v62 = vld [vmem:[#allocation6 + $0x1f8] sm:$0xff] }
 0x313   :  { %2237 = vmatpush1.bf16.msra.mxu0 %v3486_v19  ;;  %2323 = vmatpush1.bf16.msra.mxu1 %v3488_v20  ;;  %v614_v19 = vld [vmem:[#allocation6 + $0xb8] sm:$0xff]  ;;  %v3290_v20 = vcombine.low %v601_v3, %v605_v4  ;;  %v657_v3 = vld [vmem:[#allocation6 + $0x210] sm:$0xff] }
 0x314   :  { %2238 = vmatprep.subr.bf16.mxu0 %v3495_v21  ;;  %2324 = vmatprep.subr.bf16.mxu1 %v3497_v22  ;;  %v3292_v21 = vcombine.low %v602_v5, %v606_v6  ;;  %v3299_v22 = vcombine.high %v609_v11, %v613_v12  ;;  %v3301_v23 = vcombine.high %v610_v16, %v614_v19  ;;  %v661_v4 = vld [vmem:[#allocation6 + $0x230] sm:$0xff]  ;;  %v658_v5 = vld [vmem:[#allocation6 + $0x218] sm:$0xff] }
 0x315   :  { %v662_v6 = vld [vmem:[#allocation6 + $0x238] sm:$0xff] }
 0x317   :  { %2239 = vmatpush1.bf16.msra.mxu0 %v3494_v27  ;;  %2325 = vmatpush1.bf16.msra.mxu1 %v3496_v28  ;;  %v622_v27 = vld [vmem:[#allocation6 + $0xf8] sm:$0xff]  ;;  %v3298_v28 = vcombine.low %v609_v11, %v613_v12  ;;  %v665_v11 = vld [vmem:[#allocation6 + $0x250] sm:$0xff] }
 0x318   :  { %2240 = vmatprep.subr.bf16.mxu0 %v3503_v29  ;;  %2326 = vmatprep.subr.bf16.mxu1 %v3505_v30  ;;  %v3300_v29 = vcombine.low %v610_v16, %v614_v19  ;;  %v3307_v30 = vcombine.high %v617_v24, %v621_v25  ;;  %v3309_v31 = vcombine.high %v618_v26, %v622_v27  ;;  %v669_v12 = vld [vmem:[#allocation6 + $0x270] sm:$0xff]  ;;  %v666_v16 = vld [vmem:[#allocation6 + $0x258] sm:$0xff] }
 0x319   :  { %v670_v19 = vld [vmem:[#allocation6 + $0x278] sm:$0xff] }
 0x31b   :  { %2241 = vmatpush1.bf16.msra.mxu0 %v3502_v35  ;;  %2327 = vmatpush1.bf16.msra.mxu1 %v3504_v36  ;;  %v3306_v35 = vcombine.low %v617_v24, %v621_v25  ;;  %v3308_v36 = vcombine.low %v618_v26, %v622_v27  ;;  %v673_v24 = vld [vmem:[#allocation6 + $0x290] sm:$0xff]  ;;  %v674_v26 = vld [vmem:[#allocation6 + $0x298] sm:$0xff] }
 0x31c   :  { %2242 = vmatprep.subr.bf16.mxu0 %v3511_v37  ;;  %2328 = vmatprep.subr.bf16.mxu1 %v3513_v38  ;;  %v3315_v37 = vcombine.high %v625_v32, %v629_v33  ;;  %v677_v25 = vld [vmem:[#allocation6 + $0x2b0] sm:$0xff]  ;;  %v678_v27 = vld [vmem:[#allocation6 + $0x2b8] sm:$0xff] }
 0x31f   :  { %2243 = vmatpush1.bf16.msra.mxu0 %v3510_v43  ;;  %2329 = vmatpush1.bf16.msra.mxu1 %v3512_v44  ;;  %v3314_v43 = vcombine.low %v625_v32, %v629_v33  ;;  %v681_v32 = vld [vmem:[#allocation6 + $0x2d0] sm:$0xff] }
 0x320   :  { %2244 = vmatprep.subr.bf16.mxu0 %v3519_v45  ;;  %2330 = vmatprep.subr.bf16.mxu1 %v3521_v46  ;;  %v3323_v45 = vcombine.high %v633_v39, %v637_v40  ;;  %v3325_v46 = vcombine.high %v634_v41, %v638_v42  ;;  %v685_v33 = vld [vmem:[#allocation6 + $0x2f0] sm:$0xff] }
 0x323   :  { %2245 = vmatpush1.bf16.msra.mxu0 %v3518_v55  ;;  %2331 = vmatpush1.bf16.msra.mxu1 %v3520_v56  ;;  %v3322_v55 = vcombine.low %v633_v39, %v637_v40  ;;  %v3324_v56 = vcombine.low %v634_v41, %v638_v42  ;;  %v689_v39 = vld [vmem:[#allocation6 + $0x310] sm:$0xff]  ;;  %v690_v41 = vld [vmem:[#allocation6 + $0x318] sm:$0xff] }
 0x324   :  { %2246 = vmatprep.subr.bf16.mxu0 %v3527_v57  ;;  %2332 = vmatprep.subr.bf16.mxu1 %v3529_v58  ;;  %v3331_v57 = vcombine.high %v641_v47, %v645_v50  ;;  %v3333_v58 = vcombine.high %v642_v51, %v646_v52  ;;  %v693_v40 = vld [vmem:[#allocation6 + $0x330] sm:$0xff]  ;;  %v694_v42 = vld [vmem:[#allocation6 + $0x338] sm:$0xff] }
 0x327   :  { %2247 = vmatpush1.bf16.msra.mxu0 %v3526_v63  ;;  %2333 = vmatpush1.bf16.msra.mxu1 %v3528_v0  ;;  %v3330_v63 = vcombine.low %v641_v47, %v645_v50  ;;  %v3332_v0 = vcombine.low %v642_v51, %v646_v52  ;;  %v697_v47 = vld [vmem:[#allocation6 + $0x350] sm:$0xff]  ;;  %v698_v51 = vld [vmem:[#allocation6 + $0x358] sm:$0xff] }
 0x328   :  { %2345 = vmatprep.subr.bf16.mxu0 %v3283_v1  ;;  %2431 = vmatprep.subr.bf16.mxu1 %v3285_v2  ;;  %v3339_v1 = vcombine.high %v649_v59, %v653_v60  ;;  %v3341_v2 = vcombine.high %v650_v61, %v654_v62  ;;  %v701_v50 = vld [vmem:[#allocation6 + $0x370] sm:$0xff]  ;;  %v702_v52 = vld [vmem:[#allocation6 + $0x378] sm:$0xff] }
 0x32a   :  { %2249 = vmatmul.mubr.bf16.vlgmr.msra.gmra.mrb[8].mxu0 %v4164_v49  ;;  %2335 = vmatmul.mubr.bf16.vlgmr.msra.gmra.mrb[8].mxu1 %v4164_v49 }
 0x32b   :  { %2346 = vmatpush1.bf16.msra.mxu0 %v3282_v7  ;;  %2377 = vmatprep.mubr.bf16.mxu0 %v4166_v53  ;;  %v3338_v7 = vcombine.low %v649_v59, %v653_v60  ;;  %v705_v59 = vld [vmem:[#allocation6 + $0x390] sm:$0xff] }
 0x32c   :  { %2432 = vmatpush1.bf16.msra.mxu1 %v3284_v8  ;;  %2463 = vmatprep.mubr.bf16.mxu1 %v4166_v53  ;;  %v626_v53 = vld [vmem:[#allocation6 + $0x118] sm:$0xff]  ;;  %v3340_v8 = vcombine.low %v650_v61, %v654_v62  ;;  %v709_v60 = vld [vmem:[#allocation6 + $0x3b0] sm:$0xff] }
 0x32d   :  { %2347 = vmatprep.subr.bf16.mxu0 %v3291_v9  ;;  %2433 = vmatprep.subr.bf16.mxu1 %v3293_v10  ;;  %v3317_v38 = vcombine.high %v626_v53, %v630_v34  ;;  %v3316_v44 = vcombine.low %v626_v53, %v630_v34  ;;  %v3347_v9 = vcombine.high %v657_v3, %v661_v4  ;;  %v682_v53 = vld [vmem:[#allocation6 + $0x2d8] sm:$0xff] }
 0x32e   :  { %v3349_v10 = vcombine.high %v658_v5, %v662_v6  ;;  %v686_v34 = vld [vmem:[#allocation6 + $0x2f8] sm:$0xff] }
 0x32f   :  { %2348 = vmatpush1.bf16.msra.mxu0 %v3290_v20  ;;  %v3346_v20 = vcombine.low %v657_v3, %v661_v4  ;;  %v706_v61 = vld [vmem:[#allocation6 + $0x398] sm:$0xff]  ;;  %v713_v3 = vld [vmem:[#allocation6 + $0x3d0] sm:$0xff] }
 0x330   :  { %2434 = vmatpush1.bf16.msra.mxu1 %v3292_v21  ;;  %2349 = vmatprep.subr.bf16.mxu0 %v3299_v22  ;;  %v3348_v21 = vcombine.low %v658_v5, %v662_v6  ;;  %v3355_v22 = vcombine.high %v665_v11, %v669_v12  ;;  %v710_v62 = vld [vmem:[#allocation6 + $0x3b8] sm:$0xff]  ;;  %v717_v4 = vld [vmem:[#allocation6 + $0x3f0] sm:$0xff] }
 0x331   :  { %2435 = vmatprep.subr.bf16.mxu1 %v3301_v23  ;;  %v3357_v23 = vcombine.high %v666_v16, %v670_v19  ;;  %v714_v5 = vld [vmem:[#allocation6 + $0x3d8] sm:$0xff] }
 0x332   :  { %v718_v6 = vld [vmem:[#allocation6 + $0x3f8] sm:$0xff] }
 0x333   :  { %2350 = vmatpush1.bf16.msra.mxu0 %v3298_v28  ;;  %v3354_v28 = vcombine.low %v665_v11, %v669_v12  ;;  %v721_v11 = vld [vmem:[#allocation6 + $0x410] sm:$0xff] }
 0x334   :  { %2436 = vmatpush1.bf16.msra.mxu1 %v3300_v29  ;;  %2351 = vmatprep.subr.bf16.mxu0 %v3307_v30  ;;  %v3356_v29 = vcombine.low %v666_v16, %v670_v19  ;;  %v3363_v30 = vcombine.high %v673_v24, %v677_v25  ;;  %v725_v12 = vld [vmem:[#allocation6 + $0x430] sm:$0xff]  ;;  %v722_v16 = vld [vmem:[#allocation6 + $0x418] sm:$0xff] }
 0x335   :  { %2437 = vmatprep.subr.bf16.mxu1 %v3309_v31  ;;  %v3365_v31 = vcombine.high %v674_v26, %v678_v27  ;;  %v726_v19 = vld [vmem:[#allocation6 + $0x438] sm:$0xff] }
 0x337   :  { %2352 = vmatpush1.bf16.msra.mxu0 %v3306_v35  ;;  %v3362_v35 = vcombine.low %v673_v24, %v677_v25  ;;  %v729_v24 = vld [vmem:[#allocation6 + $0x450] sm:$0xff] }
 0x338   :  { %2438 = vmatpush1.bf16.msra.mxu1 %v3308_v36  ;;  %2353 = vmatprep.subr.bf16.mxu0 %v3315_v37  ;;  %v3364_v36 = vcombine.low %v674_v26, %v678_v27  ;;  %v3371_v37 = vcombine.high %v681_v32, %v685_v33  ;;  %v733_v25 = vld [vmem:[#allocation6 + $0x470] sm:$0xff]  ;;  %v3410_v26 = vcombine.low %v721_v11, %v725_v12  ;;  %v730_v27 = vld [vmem:[#allocation6 + $0x458] sm:$0xff] }
 0x339   :  { %2439 = vmatprep.subr.bf16.mxu1 %v3317_v38  ;;  %v3373_v38 = vcombine.high %v682_v53, %v686_v34 }
 0x33b   :  { %2354 = vmatpush1.bf16.msra.mxu0 %v3314_v43  ;;  %v3370_v43 = vcombine.low %v681_v32, %v685_v33  ;;  %v741_v32 = vld [vmem:[#allocation6 + $0x4b0] sm:$0xff] }
 0x33c   :  { %2440 = vmatpush1.bf16.msra.mxu1 %v3316_v44  ;;  %2355 = vmatprep.subr.bf16.mxu0 %v3323_v45  ;;  %v3372_v44 = vcombine.low %v682_v53, %v686_v34  ;;  %v3379_v45 = vcombine.high %v689_v39, %v693_v40  ;;  %v738_v53 = vld [vmem:[#allocation6 + $0x498] sm:$0xff] }
 0x33d   :  { %2441 = vmatprep.subr.bf16.mxu1 %v3325_v46  ;;  %v3381_v46 = vcombine.high %v690_v41, %v694_v42  ;;  %v742_v34 = vld [vmem:[#allocation6 + $0x4b8] sm:$0xff] }
 0x33f   :  { %2356 = vmatpush1.bf16.msra.mxu0 %v3322_v55  ;;  %v3378_v55 = vcombine.low %v689_v39, %v693_v40  ;;  %v745_v39 = vld [vmem:[#allocation6 + $0x4d0] sm:$0xff] }
 0x340   :  { %2442 = vmatpush1.bf16.msra.mxu1 %v3324_v56  ;;  %2357 = vmatprep.subr.bf16.mxu0 %v3331_v57  ;;  %v3380_v56 = vcombine.low %v690_v41, %v694_v42  ;;  %v3387_v57 = vcombine.high %v697_v47, %v701_v50  ;;  %v749_v40 = vld [vmem:[#allocation6 + $0x4f0] sm:$0xff]  ;;  %v746_v41 = vld [vmem:[#allocation6 + $0x4d8] sm:$0xff] }
 0x341   :  { %2443 = vmatprep.subr.bf16.mxu1 %v3333_v58  ;;  %v3389_v58 = vcombine.high %v698_v51, %v702_v52  ;;  %v750_v42 = vld [vmem:[#allocation6 + $0x4f8] sm:$0xff] }
 0x343   :  { %2358 = vmatpush1.bf16.msra.mxu0 %v3330_v63  ;;  %v3386_v63 = vcombine.low %v697_v47, %v701_v50  ;;  %v757_v47 = vld [vmem:[#allocation6 + $0x530] sm:$0xff]  ;;  %v754_v50 = vld [vmem:[#allocation6 + $0x518] sm:$0xff] }
 0x344   :  { %2444 = vmatpush1.bf16.msra.mxu1 %v3332_v0  ;;  %2359 = vmatprep.subr.bf16.mxu0 %v3339_v1  ;;  %v3388_v0 = vcombine.low %v698_v51, %v702_v52  ;;  %v3395_v1 = vcombine.high %v705_v59, %v709_v60  ;;  %v758_v51 = vld [vmem:[#allocation6 + $0x538] sm:$0xff]  ;;  %v3436_v52 = vcombine.low %v746_v41, %v750_v42 }
 0x345   :  { %2445 = vmatprep.subr.bf16.mxu1 %v3341_v2  ;;  %v3397_v2 = vcombine.high %v706_v61, %v710_v62 }
 0x347   :  { %2360 = vmatpush1.bf16.msra.mxu0 %v3338_v7  ;;  %v3394_v7 = vcombine.low %v705_v59, %v709_v60  ;;  %v762_v59 = vld [vmem:[#allocation6 + $0x558] sm:$0xff] }
 0x348   :  { %2446 = vmatpush1.bf16.msra.mxu1 %v3340_v8  ;;  %2361 = vmatprep.subr.bf16.mxu0 %v3347_v9  ;;  %v3396_v8 = vcombine.low %v706_v61, %v710_v62  ;;  %v3403_v9 = vcombine.high %v713_v3, %v717_v4  ;;  %v766_v60 = vld [vmem:[#allocation6 + $0x578] sm:$0xff]  ;;  %v3444_v62 = vcombine.low %v754_v50, %v758_v51 }
 0x349   :  { %2447 = vmatprep.subr.bf16.mxu1 %v3349_v10  ;;  %v3405_v10 = vcombine.high %v714_v5, %v718_v6 }
 0x34b   :  { %2362 = vmatpush1.bf16.msra.mxu0 %v3346_v20  ;;  %v3402_v20 = vcombine.low %v713_v3, %v717_v4  ;;  %v770_v3 = vld [vmem:[#allocation6 + $0x598] sm:$0xff] }
 0x34c   :  { %2448 = vmatpush1.bf16.msra.mxu1 %v3348_v21  ;;  %2363 = vmatprep.subr.bf16.mxu0 %v3355_v22  ;;  %v3404_v21 = vcombine.low %v714_v5, %v718_v6  ;;  %v3411_v22 = vcombine.high %v721_v11, %v725_v12  ;;  %v774_v4 = vld [vmem:[#allocation6 + $0x5b8] sm:$0xff]  ;;  %v3452_v6 = vcombine.low %v762_v59, %v766_v60 }
 0x34d   :  { %2449 = vmatprep.subr.bf16.mxu1 %v3357_v23  ;;  %v3413_v23 = vcombine.high %v722_v16, %v726_v19  ;;  %v778_v11 = vld [vmem:[#allocation6 + $0x5d8] sm:$0xff] }
 0x34e   :  { %v782_v12 = vld [vmem:[#allocation6 + $0x5f8] sm:$0xff] }
 0x34f   :  { %2364 = vmatpush1.bf16.msra.mxu0 %v3354_v28  ;;  %v734_v28 = vld [vmem:[#allocation6 + $0x478] sm:$0xff] }
 0x350   :  { %2450 = vmatpush1.bf16.msra.mxu1 %v3356_v29  ;;  %2365 = vmatprep.subr.bf16.mxu0 %v3363_v30  ;;  %v3412_v29 = vcombine.low %v722_v16, %v726_v19  ;;  %v3419_v30 = vcombine.high %v729_v24, %v733_v25  ;;  %v3421_v33 = vcombine.high %v730_v27, %v734_v28 }
 0x351   :  { %2451 = vmatprep.subr.bf16.mxu1 %v3365_v31  ;;  %v737_v31 = vld [vmem:[#allocation6 + $0x490] sm:$0xff]  ;;  %v3460_v19 = vcombine.low %v770_v3, %v774_v4 }
 0x353   :  { %2366 = vmatpush1.bf16.msra.mxu0 %v3362_v35  ;;  %v3418_v35 = vcombine.low %v729_v24, %v733_v25  ;;  %v786_v24 = vld [vmem:[#allocation6 + $0x618] sm:$0xff] }
 0x354   :  { %2452 = vmatpush1.bf16.msra.mxu1 %v3364_v36  ;;  %2367 = vmatprep.subr.bf16.mxu0 %v3371_v37  ;;  %v3420_v36 = vcombine.low %v730_v27, %v734_v28  ;;  %v3427_v37 = vcombine.high %v737_v31, %v741_v32  ;;  %v790_v25 = vld [vmem:[#allocation6 + $0x638] sm:$0xff]  ;;  %v3468_v27 = vcombine.low %v778_v11, %v782_v12 }
 0x355   :  { %2453 = vmatprep.subr.bf16.mxu1 %v3373_v38  ;;  %v3429_v38 = vcombine.high %v738_v53, %v742_v34 }
 0x357   :  { %2368 = vmatpush1.bf16.msra.mxu0 %v3370_v43  ;;  %v3426_v43 = vcombine.low %v737_v31, %v741_v32  ;;  %v797_v31 = vld [vmem:[#allocation6 + $0x670] sm:$0xff]  ;;  %v794_v32 = vld [vmem:[#allocation6 + $0x658] sm:$0xff] }
 0x358   :  { %2454 = vmatpush1.bf16.msra.mxu1 %v3372_v44  ;;  %2369 = vmatprep.subr.bf16.mxu0 %v3379_v45  ;;  %v3435_v44 = vcombine.high %v745_v39, %v749_v40  ;;  %v3437_v45 = vcombine.high %v746_v41, %v750_v42 }
 0x359   :  { %2455 = vmatprep.subr.bf16.mxu1 %v3381_v46  ;;  %v753_v46 = vld [vmem:[#allocation6 + $0x510] sm:$0xff] }
 0x35a   :  { %v3442_v61 = vcombine.low %v753_v46, %v757_v47 }
 0x35b   :  { %2370 = vmatpush1.bf16.msra.mxu0 %v3378_v55  ;;  %v3443_v55 = vcombine.high %v753_v46, %v757_v47  ;;  %v810_v46 = vld [vmem:[#allocation6 + $0x6d8] sm:$0xff] }
 0x35c   :  { %2456 = vmatpush1.bf16.msra.mxu1 %v3380_v56  ;;  %2371 = vmatprep.subr.bf16.mxu0 %v3387_v57  ;;  %v3445_v56 = vcombine.high %v754_v50, %v758_v51  ;;  %v761_v57 = vld [vmem:[#allocation6 + $0x550] sm:$0xff]  ;;  %v814_v47 = vld [vmem:[#allocation6 + $0x6f8] sm:$0xff] }
 0x35d   :  { %2457 = vmatprep.subr.bf16.mxu1 %v3389_v58  ;;  %v765_v58 = vld [vmem:[#allocation6 + $0x570] sm:$0xff] }
 0x35e   :  { %v3450_v5 = vcombine.low %v761_v57, %v765_v58 }
 0x35f   :  { %2372 = vmatpush1.bf16.msra.mxu0 %v3386_v63  ;;  %v3451_v63 = vcombine.high %v761_v57, %v765_v58  ;;  %v818_v57 = vld [vmem:[#allocation6 + $0x718] sm:$0xff] }
 0x360   :  { %2458 = vmatpush1.bf16.msra.mxu1 %v3388_v0  ;;  %2373 = vmatprep.subr.bf16.mxu0 %v3395_v1  ;;  %v3453_v0 = vcombine.high %v762_v59, %v766_v60  ;;  %v769_v1 = vld [vmem:[#allocation6 + $0x590] sm:$0xff]  ;;  %v822_v58 = vld [vmem:[#allocation6 + $0x738] sm:$0xff]  ;;  %v3500_v60 = vcombine.low %v810_v46, %v814_v47 }
 0x361   :  { %2459 = vmatprep.subr.bf16.mxu1 %v3397_v2  ;;  %v773_v2 = vld [vmem:[#allocation6 + $0x5b0] sm:$0xff] }
 0x362   :  { %v3458_v16 = vcombine.low %v769_v1, %v773_v2 }
 0x363   :  { %2374 = vmatpush1.bf16.msra.mxu0 %v3394_v7  ;;  %v3459_v7 = vcombine.high %v769_v1, %v773_v2  ;;  %v826_v1 = vld [vmem:[#allocation6 + $0x758] sm:$0xff] }
 0x364   :  { %2460 = vmatpush1.bf16.msra.mxu1 %v3396_v8  ;;  %2375 = vmatprep.subr.bf16.mxu0 %v3403_v9  ;;  %v3461_v8 = vcombine.high %v770_v3, %v774_v4  ;;  %v777_v9 = vld [vmem:[#allocation6 + $0x5d0] sm:$0xff]  ;;  %v830_v2 = vld [vmem:[#allocation6 + $0x778] sm:$0xff]  ;;  %v3508_v4 = vcombine.low %v818_v57, %v822_v58 }
 0x365   :  { %2461 = vmatprep.subr.bf16.mxu1 %v3405_v10  ;;  %v781_v10 = vld [vmem:[#allocation6 + $0x5f0] sm:$0xff] }
 0x367   :  { %2376 = vmatpush1.bf16.msra.mxu0 %v3402_v20  ;;  %v3467_v20 = vcombine.high %v777_v9, %v781_v10 }
 0x368   :  { %2462 = vmatpush1.bf16.msra.mxu1 %v3404_v21  ;;  %2388 = vmatprep.subr.bf16.mxu0 %v3411_v22  ;;  %v3469_v21 = vcombine.high %v778_v11, %v782_v12  ;;  %v785_v22 = vld [vmem:[#allocation6 + $0x610] sm:$0xff]  ;;  %v3516_v12 = vcombine.low %v826_v1, %v830_v2 }
 0x369   :  { %2474 = vmatprep.subr.bf16.mxu1 %v3413_v23  ;;  %v789_v23 = vld [vmem:[#allocation6 + $0x630] sm:$0xff] }
 0x36a   :  { %2378 = vmatmul.mubr.bf16.vlgmr.msra.gmra.mrb[12].mxu0 %v4162_v48  ;;  %v3475_v28 = vcombine.high %v785_v22, %v789_v23 }
 0x36b   :  { %2464 = vmatmul.mubr.bf16.vlgmr.msra.gmra.mrb[12].mxu1 %v4162_v48  ;;  %2389 = vmatpush1.bf16.msra.mxu0 %v3410_v26  ;;  %v3428_v48 = vcombine.low %v738_v53, %v742_v34  ;;  %v3466_v26 = vcombine.low %v777_v9, %v781_v10  ;;  %v3474_v53 = vcombine.low %v785_v22, %v789_v23  ;;  %v834_v9 = vld [vmem:[#allocation6 + $0x798] sm:$0xff] }
 0x36c   :  { %2420 = vmatprep.mubr.bf16.mxu0 %v4168_v54  ;;  %2475 = vmatpush1.bf16.msra.mxu1 %v3412_v29  ;;  %v3477_v29 = vcombine.high %v786_v24, %v790_v25  ;;  %v3476_v34 = vcombine.low %v786_v24, %v790_v25  ;;  %v838_v10 = vld [vmem:[#allocation6 + $0x7b8] sm:$0xff] }
 0x36d   :  { %2506 = vmatprep.mubr.bf16.mxu1 %v4168_v54  ;;  %2390 = vmatprep.subr.bf16.mxu0 %v3419_v30  ;;  %v3434_v54 = vcombine.low %v745_v39, %v749_v40  ;;  %v793_v30 = vld [vmem:[#allocation6 + $0x650] sm:$0xff]  ;;  %v802_v39 = vld [vmem:[#allocation6 + $0x698] sm:$0xff]  ;;  %v3524_v25 = vcombine.low %v834_v9, %v838_v10 }
 0x36e   :  { %2476 = vmatprep.subr.bf16.mxu1 %v3421_v33  ;;  %v798_v33 = vld [vmem:[#allocation6 + $0x678] sm:$0xff]  ;;  %v3482_v41 = vcombine.low %v793_v30, %v797_v31 }
 0x36f   :  { %2391 = vmatpush1.bf16.msra.mxu0 %v3418_v35  ;;  %v3483_v35 = vcombine.high %v793_v30, %v797_v31  ;;  %v806_v40 = vld [vmem:[#allocation6 + $0x6b8] sm:$0xff]  ;;  %v3484_v42 = vcombine.low %v794_v32, %v798_v33  ;;  %v3830_v30 = vld [vmem:[#allocation7 + $0x40] sm:$0xff]  }
 0x370   :  { %2477 = vmatpush1.bf16.msra.mxu1 %v3420_v36  ;;  %2392 = vmatprep.subr.bf16.mxu0 %v3427_v37  ;;  %v3485_v36 = vcombine.high %v794_v32, %v798_v33  ;;  %v801_v37 = vld [vmem:[#allocation6 + $0x690] sm:$0xff]  ;;  %v3492_v51 = vcombine.low %v802_v39, %v806_v40  ;;  %v842_v22 = vld [vmem:[#allocation6 + $0x7d8] sm:$0xff]  ;;  %v3831_v31 = vld [vmem:[#allocation7 + $0xc0] sm:$0xff]  }
 0x371   :  { %2478 = vmatprep.subr.bf16.mxu1 %v3429_v38  ;;  %v805_v38 = vld [vmem:[#allocation6 + $0x6b0] sm:$0xff]  ;;  %v846_v23 = vld [vmem:[#allocation6 + $0x7f8] sm:$0xff]  ;;  %v3832_v32 = vld [vmem:[#allocation7] sm:$0xff]  }
 0x372   :  { %v3490_v50 = vcombine.low %v801_v37, %v805_v38  ;;  %v3833_v33 = vld [vmem:[#allocation7 + $0x80] sm:$0xff]  }
 0x373   :  { %2393 = vmatpush1.bf16.msra.mxu0 %v3426_v43  ;;  %v3491_v43 = vcombine.high %v801_v37, %v805_v38  ;;  %v3838_v37 = vld [vmem:[#allocation7 + $0x50] sm:$0xff]  }
 0x374   :  { %2479 = vmatpush1.bf16.msra.mxu1 %v3428_v48  ;;  %2394 = vmatprep.subr.bf16.mxu0 %v3435_v44  ;;  %v3493_v48 = vcombine.high %v802_v39, %v806_v40  ;;  %v809_v44 = vld [vmem:[#allocation6 + $0x6d0] sm:$0xff] }
 0x375   :  { %2480 = vmatprep.subr.bf16.mxu1 %v3437_v45  ;;  %v813_v45 = vld [vmem:[#allocation6 + $0x6f0] sm:$0xff] }
 0x376   :  { %v3498_v59 = vcombine.low %v809_v44, %v813_v45  ;;  %v3839_v38 = vld [vmem:[#allocation7 + $0xd0] sm:$0xff]  }
 0x377   :  { %2395 = vmatpush1.bf16.msra.mxu0 %v3434_v54  ;;  %v3499_v54 = vcombine.high %v809_v44, %v813_v45  ;;  %v3840_v39 = vld [vmem:[#allocation7 + $0x10] sm:$0xff]   ;;  %v3847_v44 = vld [vmem:[#allocation7 + $0xe0] sm:$0xff]  }
 0x378   :  { %2481 = vmatpush1.bf16.msra.mxu1 %v3436_v52  ;;  %2396 = vmatprep.subr.bf16.mxu0 %v3443_v55  ;;  %v3501_v52 = vcombine.high %v810_v46, %v814_v47  ;;  %v817_v55 = vld [vmem:[#allocation6 + $0x710] sm:$0xff]  ;;  %v3848_v45 = vld [vmem:[#allocation7 + $0x20] sm:$0xff]   ;;  %v3850_v47 = vld [vmem:[#allocation7 + $0x68] sm:$0xff]  }
 0x379   :  { %2482 = vmatprep.subr.bf16.mxu1 %v3445_v56  ;;  %v821_v56 = vld [vmem:[#allocation6 + $0x730] sm:$0xff]  ;;  %v3849_v46 = vld [vmem:[#allocation7 + $0xa0] sm:$0xff]  }
 0x37a   :  { %v3506_v3 = vcombine.low %v817_v55, %v821_v56  ;;  %v3841_v40 = vld [vmem:[#allocation7 + $0x90] sm:$0xff]  }
 0x37b   :  { %2397 = vmatpush1.bf16.msra.mxu0 %v3442_v61  ;;  %v3507_v61 = vcombine.high %v817_v55, %v821_v56  ;;  %v3855_v55 = vld [vmem:[#allocation7 + $0xf0] sm:$0xff]  }
 0x37c   :  { %2483 = vmatpush1.bf16.msra.mxu1 %v3444_v62  ;;  %2398 = vmatprep.subr.bf16.mxu0 %v3451_v63  ;;  %v3509_v62 = vcombine.high %v818_v57, %v822_v58  ;;  %v825_v63 = vld [vmem:[#allocation6 + $0x750] sm:$0xff]  ;;  %v3858_v58 = vld [vmem:[#allocation7 + $0x78] sm:$0xff]  }
 0x37d   :  { %2484 = vmatprep.subr.bf16.mxu1 %v3453_v0  ;;  %v829_v0 = vld [vmem:[#allocation6 + $0x770] sm:$0xff] }
 0x37e   :  { %v3514_v11 = vcombine.low %v825_v63, %v829_v0  ;;  %v3856_v56 = vld [vmem:[#allocation7 + $0x30] sm:$0xff]  }
 0x37f   :  { %2399 = vmatpush1.bf16.msra.mxu0 %v3450_v5  ;;  %v3515_v5 = vcombine.high %v825_v63, %v829_v0  ;;  %v3857_v57 = vld [vmem:[#allocation7 + $0xb0] sm:$0xff]   ;;  %v3863_v63 = vld [vmem:[#allocation7 + $0x1c0] sm:$0xff]  }
 0x380   :  { %2485 = vmatpush1.bf16.msra.mxu1 %v3452_v6  ;;  %2400 = vmatprep.subr.bf16.mxu0 %v3459_v7  ;;  %v3517_v6 = vcombine.high %v826_v1, %v830_v2  ;;  %v833_v7 = vld [vmem:[#allocation6 + $0x790] sm:$0xff]  ;;  %v4189_v0 = vld [vmem:[%s4228_s8] sm:$0xff] }
 0x381   :  { %2486 = vmatprep.subr.bf16.mxu1 %v3461_v8  ;;  %v837_v8 = vld [vmem:[#allocation6 + $0x7b0] sm:$0xff]  ;;  %v856_v1 = vrot.slane %v4189_v0, %v319_v14  ;;  %v864_v2 = vrot.slane %v4189_v0, %v327_v15 }
 0x382   :  { %v3522_v24 = vcombine.low %v833_v7, %v837_v8 }
 0x383   :  { %2401 = vmatpush1.bf16.msra.mxu0 %v3458_v16  ;;  %v3523_v16 = vcombine.high %v833_v7, %v837_v8 }
 0x384   :  { %2487 = vmatpush1.bf16.msra.mxu1 %v3460_v19  ;;  %2402 = vmatprep.subr.bf16.mxu0 %v3467_v20  ;;  %v3525_v19 = vcombine.high %v834_v9, %v838_v10  ;;  %v841_v20 = vld [vmem:[#allocation6 + $0x7d0] sm:$0xff] }
 0x385   :  { %2488 = vmatprep.subr.bf16.mxu1 %v3469_v21  ;;  %v845_v21 = vld [vmem:[#allocation6 + $0x7f0] sm:$0xff] }
 0x387   :  { %2403 = vmatpush1.bf16.msra.mxu0 %v3466_v26  ;;  %v3531_v26 = vcombine.high %v841_v20, %v845_v21 }
 0x388   :  { %2489 = vmatpush1.bf16.msra.mxu1 %v3468_v27  ;;  %2404 = vmatprep.subr.bf16.mxu0 %v3475_v28  ;;  %v3533_v27 = vcombine.high %v842_v22, %v846_v23  ;;  %v3530_v28 = vcombine.low %v841_v20, %v845_v21 }
 0x389   :  { %2490 = vmatprep.subr.bf16.mxu1 %v3477_v29  ;;  %v3532_v29 = vcombine.low %v842_v22, %v846_v23 }
 0x38b   :  { %2405 = vmatpush1.bf16.msra.mxu0 %v3474_v53  ;;  %v3834_v53 = vld [vmem:[#allocation7 + $0x48] sm:$0xff]  }
 0x38c   :  { %2491 = vmatpush1.bf16.msra.mxu1 %v3476_v34  ;;  %2406 = vmatprep.subr.bf16.mxu0 %v3483_v35  ;;  %v3835_v34 = vld [vmem:[#allocation7 + $0xc8] sm:$0xff]  }
 0x38d   :  { %2492 = vmatprep.subr.bf16.mxu1 %v3485_v36  ;;  %v3836_v35 = vld [vmem:[#allocation7 + $0x8] sm:$0xff]  }
 0x38e   :  { %v3837_v36 = vld [vmem:[#allocation7 + $0x88] sm:$0xff]  }
 0x38f   :  { %2407 = vmatpush1.bf16.msra.mxu0 %v3482_v41  ;;  %v3842_v41 = vld [vmem:[#allocation7 + $0x58] sm:$0xff]  }
 0x390   :  { %2493 = vmatpush1.bf16.msra.mxu1 %v3484_v42  ;;  %2408 = vmatprep.subr.bf16.mxu0 %v3491_v43  ;;  %v3843_v42 = vld [vmem:[#allocation7 + $0xd8] sm:$0xff]  }
 0x391   :  { %2494 = vmatprep.subr.bf16.mxu1 %v3493_v48  ;;  %v3844_v43 = vld [vmem:[#allocation7 + $0x18] sm:$0xff]   ;;  %v3846_v48 = vld [vmem:[#allocation7 + $0x60] sm:$0xff]  }
 0x393   :  { %2409 = vmatpush1.bf16.msra.mxu0 %v3490_v50  ;;  %v3851_v50 = vld [vmem:[#allocation7 + $0xe8] sm:$0xff]  }
 0x394   :  { %2495 = vmatpush1.bf16.msra.mxu1 %v3492_v51  ;;  %2410 = vmatprep.subr.bf16.mxu0 %v3499_v54  ;;  %v3852_v51 = vld [vmem:[#allocation7 + $0x28] sm:$0xff]  }
 0x395   :  { %2496 = vmatprep.subr.bf16.mxu1 %v3501_v52  ;;  %v3853_v54 = vld [vmem:[#allocation7 + $0xa8] sm:$0xff]   ;;  %v3854_v52 = vld [vmem:[#allocation7 + $0x70] sm:$0xff]  }
 0x397   :  { %2411 = vmatpush1.bf16.msra.mxu0 %v3498_v59  ;;  %v3859_v59 = vld [vmem:[#allocation7 + $0xf8] sm:$0xff]  }
 0x398   :  { %2497 = vmatpush1.bf16.msra.mxu1 %v3500_v60  ;;  %2412 = vmatprep.subr.bf16.mxu0 %v3507_v61  ;;  %v3860_v60 = vld [vmem:[#allocation7 + $0x38] sm:$0xff]  }
 0x399   :  { %2498 = vmatprep.subr.bf16.mxu1 %v3509_v62  ;;  %v3861_v61 = vld [vmem:[#allocation7 + $0xb8] sm:$0xff]   ;;  %v3862_v62 = vld [vmem:[#allocation7 + $0x140] sm:$0xff]  }
 0x39b   :  { %2413 = vmatpush1.bf16.msra.mxu0 %v3506_v3  ;;  %v860_v3 = vrot.slane %v4189_v0, %v323_v17 }
 0x39c   :  { %2499 = vmatpush1.bf16.msra.mxu1 %v3508_v4  ;;  %2414 = vmatprep.subr.bf16.mxu0 %v3515_v5  ;;  %v868_v4 = vrot.slane %v4189_v0, %v331_v18 }
 0x39d   :  { %2500 = vmatprep.subr.bf16.mxu1 %v3517_v6 }
 0x39f   :  { %2415 = vmatpush1.bf16.msra.mxu0 %v3514_v11 }
 0x3a0   :  { %2501 = vmatpush1.bf16.msra.mxu1 %v3516_v12  ;;  %2416 = vmatprep.subr.bf16.mxu0 %v3523_v16 }
 0x3a1   :  { %2502 = vmatprep.subr.bf16.mxu1 %v3525_v19 }
 0x3a3   :  { %2417 = vmatpush1.bf16.msra.mxu0 %v3522_v24 }
 0x3a4   :  { %2503 = vmatpush1.bf16.msra.mxu1 %v3524_v25  ;;  %2418 = vmatprep.subr.bf16.mxu0 %v3531_v26 }
 0x3a5   :  { %2504 = vmatprep.subr.bf16.mxu1 %v3533_v27 }
 0x3a7   :  { %2419 = vmatpush1.bf16.msra.mxu0 %v3530_v28 }
 0x3a8   :  { %2505 = vmatpush1.bf16.msra.mxu1 %v3532_v29  ;;  %3611 = vmatprep.subr.bf16.mxu0 %v3830_v30 }
 0x3a9   :  { %3633 = vmatprep.subr.bf16.mxu1 %v3831_v31 }
 0x3aa   :  { %2421 = vmatmul.mubr.bf16.vlgmr.msra.gmra.mrb[12].mxu0 %v4164_v49 }
 0x3ab   :  { %2507 = vmatmul.mubr.bf16.vlgmr.msra.gmra.mrb[12].mxu1 %v4164_v49  ;;  %3612 = vmatpush3.bf16.msra.mxu0 %v3832_v32  ;;  %v3845_v49 = vld [vmem:[#allocation7 + $0x98] sm:$0xff]  }
 0x3ac   :  { %3634 = vmatpush3.bf16.msra.mxu1 %v3833_v33  ;;  %3613 = vmatprep.subr.bf16.mxu0 %v3834_v53  ;;  %v3864_v53 = vld [vmem:[#allocation7 + $0x100] sm:$0xff]  }
 0x3ad   :  { %3635 = vmatprep.subr.bf16.mxu1 %v3835_v34  ;;  %v3865_v34 = vld [vmem:[#allocation7 + $0x180] sm:$0xff]  }
 0x3af   :  { %3614 = vmatpush3.bf16.msra.mxu0 %v3836_v35  ;;  %v3866_v35 = vld [vmem:[#allocation7 + $0x148] sm:$0xff]  }
 0x3b0   :  { %3636 = vmatpush3.bf16.msra.mxu1 %v3837_v36  ;;  %3615 = vmatprep.subr.bf16.mxu0 %v3838_v37  ;;  %v3867_v36 = vld [vmem:[#allocation7 + $0x1c8] sm:$0xff]  }
 0x3b1   :  { %3637 = vmatprep.subr.bf16.mxu1 %v3839_v38  ;;  %v3868_v37 = vld [vmem:[#allocation7 + $0x108] sm:$0xff]  }
 0x3b2   :  { %v3869_v38 = vld [vmem:[#allocation7 + $0x188] sm:$0xff]  }
 0x3b3   :  { %3616 = vmatpush3.bf16.msra.mxu0 %v3840_v39  ;;  %v3870_v39 = vld [vmem:[#allocation7 + $0x150] sm:$0xff]  }
 0x3b4   :  { %3638 = vmatpush3.bf16.msra.mxu1 %v3841_v40  ;;  %3617 = vmatprep.subr.bf16.mxu0 %v3842_v41  ;;  %v3871_v40 = vld [vmem:[#allocation7 + $0x1d0] sm:$0xff]  }
 0x3b5   :  { %3639 = vmatprep.subr.bf16.mxu1 %v3843_v42  ;;  %v3872_v41 = vld [vmem:[#allocation7 + $0x110] sm:$0xff]  }
 0x3b6   :  { %v3873_v42 = vld [vmem:[#allocation7 + $0x190] sm:$0xff]  }
 0x3b7   :  { %3618 = vmatpush3.bf16.msra.mxu0 %v3844_v43  ;;  %v3874_v43 = vld [vmem:[#allocation7 + $0x158] sm:$0xff]  }
 0x3b8   :  { %3640 = vmatpush3.bf16.msra.mxu1 %v3845_v49  ;;  %3619 = vmatprep.subr.bf16.mxu0 %v3846_v48  ;;  %v3875_v49 = vld [vmem:[#allocation7 + $0x1d8] sm:$0xff]  }
 0x3b9   :  { %3641 = vmatprep.subr.bf16.mxu1 %v3847_v44  ;;  %v3876_v48 = vld [vmem:[#allocation7 + $0x118] sm:$0xff]  }
 0x3ba   :  { %v3877_v44 = vld [vmem:[#allocation7 + $0x198] sm:$0xff]  }
 0x3bb   :  { %3620 = vmatpush3.bf16.msra.mxu0 %v3848_v45  ;;  %v3878_v45 = vld [vmem:[#allocation7 + $0x160] sm:$0xff]  }
 0x3bc   :  { %3642 = vmatpush3.bf16.msra.mxu1 %v3849_v46  ;;  %3621 = vmatprep.subr.bf16.mxu0 %v3850_v47  ;;  %v3879_v46 = vld [vmem:[#allocation7 + $0x1e0] sm:$0xff]  }
 0x3bd   :  { %3643 = vmatprep.subr.bf16.mxu1 %v3851_v50  ;;  %v3880_v47 = vld [vmem:[#allocation7 + $0x120] sm:$0xff]  }
 0x3be   :  { %v3881_v50 = vld [vmem:[#allocation7 + $0x1a0] sm:$0xff]  }
 0x3bf   :  { %3622 = vmatpush3.bf16.msra.mxu0 %v3852_v51  ;;  %v3882_v51 = vld [vmem:[#allocation7 + $0x168] sm:$0xff]  }
 0x3c0   :  { %3644 = vmatpush3.bf16.msra.mxu1 %v3853_v54  ;;  %3623 = vmatprep.subr.bf16.mxu0 %v3854_v52  ;;  %v3883_v54 = vld [vmem:[#allocation7 + $0x1e8] sm:$0xff]  }
 0x3c1   :  { %3645 = vmatprep.subr.bf16.mxu1 %v3855_v55  ;;  %v3884_v52 = vld [vmem:[#allocation7 + $0x128] sm:$0xff]  }
 0x3c2   :  { %v3885_v55 = vld [vmem:[#allocation7 + $0x1a8] sm:$0xff]  }
 0x3c3   :  { %3624 = vmatpush3.bf16.msra.mxu0 %v3856_v56  ;;  %v3886_v56 = vld [vmem:[#allocation7 + $0x170] sm:$0xff]  }
 0x3c4   :  { %3646 = vmatpush3.bf16.msra.mxu1 %v3857_v57  ;;  %3625 = vmatprep.subr.bf16.mxu0 %v3858_v58  ;;  %v3887_v57 = vld [vmem:[#allocation7 + $0x1f0] sm:$0xff]  }
 0x3c5   :  { %3647 = vmatprep.subr.bf16.mxu1 %v3859_v59  ;;  %v3888_v58 = vld [vmem:[#allocation7 + $0x130] sm:$0xff]  }
 0x3c6   :  { %v3889_v59 = vld [vmem:[#allocation7 + $0x1b0] sm:$0xff]  }
 0x3c7   :  { %3626 = vmatpush3.bf16.msra.mxu0 %v3860_v60  ;;  %v3890_v60 = vld [vmem:[#allocation7 + $0x178] sm:$0xff]  }
 0x3c8   :  { %3648 = vmatpush3.bf16.msra.mxu1 %v3861_v61  ;;  %3655 = vmatprep.subr.bf16.mxu0 %v3862_v62  ;;  %v3891_v61 = vld [vmem:[#allocation7 + $0x1f8] sm:$0xff]  }
 0x3c9   :  { %3677 = vmatprep.subr.bf16.mxu1 %v3863_v63  ;;  %v3892_v62 = vld [vmem:[#allocation7 + $0x138] sm:$0xff]  }
 0x3ca   :  { %v3893_v63 = vld [vmem:[#allocation7 + $0x1b8] sm:$0xff]  }
 0x3fd   :  { %v2250_v5 = vpop.f32.mrb[8].mxu0  ;;  %v2336_v6 = vpop.f32.mrb[8].mxu1 }
 0x3fe   :  { %v3727_v7 = vadd.f32 %v2250_v5, %v856_v1  ;;  %v3731_v8 = vadd.f32 %v2336_v6, %v864_v2  ;;  %v2252_v9 = vpop.f32.mrb[9].mxu0  ;;  %v2338_v10 = vpop.f32.mrb[9].mxu1 }
 0x3ff   :  { %v3728_v11 = vadd.f32 %v2252_v9, %v860_v3  ;;  %v3732_v14 = vadd.f32 %v2338_v10, %v868_v4  ;;  %v2254_v12 = vpop.f32.mrb[10].mxu0  ;;  %v2340_v16 = vpop.f32.mrb[10].mxu1 }
 0x400   :  { %v3729_v19 = vadd.f32 %v2254_v12, %v856_v1  ;;  %v3733_v15 = vadd.f32 %v2340_v16, %v864_v2  ;;  %v2256_v20 = vpop.f32.mrb[11].mxu0  ;;  %v2342_v21 = vpop.f32.mrb[11].mxu1  ;;  %v2517_v23 = vmax.f32 %v3727_v7, 0.0  ;;  %v2519_v24 = vmax.f32 %v3731_v8, 0.0 }
 0x401   :  { %v3730_v22 = vadd.f32 %v2256_v20, %v860_v3  ;;  %v3734_v17 = vadd.f32 %v2342_v21, %v868_v4  ;;  %v2518_v26 = vmax.f32 %v3728_v11, 0.0  ;;  %v2520_v27 = vmax.f32 %v3732_v14, 0.0 }
 0x402   :  { %v2525_v25 = vmax.f32 %v3729_v19, 0.0  ;;  %v2527_v18 = vmax.f32 %v3733_v15, 0.0  ;;  %v871_v1 = vsub.s32 4, %v4145_v13  ;;  %v879_v2 = vsub.s32 6, %v4145_v13 }
 0x403   :  { %v2526_v28 = vmax.f32 %v3730_v22, 0.0  ;;  %v2528_v29 = vmax.f32 %v3734_v17, 0.0  ;;  %v875_v3 = vsub.s32 5, %v4145_v13  ;;  %v883_v4 = vsub.s32 7, %v4145_v13 }
 0x404   :  { %v2662_v30 = vpack.c.bf16 %v2525_v25, %v2517_v23  ;;  %v2664_v31 = vpack.c.bf16 %v2527_v18, %v2519_v24  ;;  %v872_v5 = vrot.slane %v4189_v0, %v871_v1  ;;  %v880_v6 = vrot.slane %v4189_v0, %v879_v2 }
 0x405   :  { %v2663_v32 = vpack.c.bf16 %v2526_v28, %v2518_v26  ;;  %v2665_v33 = vpack.c.bf16 %v2528_v29, %v2520_v27  ;;  %v876_v7 = vrot.slane %v4189_v0, %v875_v3  ;;  %v884_v8 = vrot.slane %v4189_v0, %v883_v4 }
 0x407   :  { %3092 = vmatprep.mubr.bf16.mxu0 %v2663_v32  ;;  %3133 = vmatprep.mubr.bf16.mxu1 %v2665_v33 }
 0x408   :  { %3093 = vmatmul.mubr.bf16.vlgmr.msra.gmra.mrb[16].mxu0 %v2662_v30  ;;  %3134 = vmatmul.mubr.bf16.vlgmr.msra.gmra.mrb[16].mxu1 %v2664_v31 }
 0x409   :  { %3656 = vmatpush3.bf16.msra.mxu0 %v3864_v53  ;;  %3678 = vmatpush3.bf16.msra.mxu1 %v3865_v34 }
 0x40a   :  { %3657 = vmatprep.subr.bf16.mxu0 %v3866_v35  ;;  %3679 = vmatprep.subr.bf16.mxu1 %v3867_v36 }
 0x40d   :  { %3658 = vmatpush3.bf16.msra.mxu0 %v3868_v37  ;;  %3680 = vmatpush3.bf16.msra.mxu1 %v3869_v38  ;;  %v3534_v37 = vld [vmem:[%s4230_s10] ss:$0 sm:$0xff] }
 0x40e   :  { %3659 = vmatprep.subr.bf16.mxu0 %v3870_v39  ;;  %3681 = vmatprep.subr.bf16.mxu1 %v3871_v40 }
 0x411   :  { %3660 = vmatpush3.bf16.msra.mxu0 %v3872_v41  ;;  %3682 = vmatpush3.bf16.msra.mxu1 %v3873_v42 }
 0x412   :  { %3661 = vmatprep.subr.bf16.mxu0 %v3874_v43  ;;  %3683 = vmatprep.subr.bf16.mxu1 %v3875_v49 }
 0x415   :  { %3662 = vmatpush3.bf16.msra.mxu0 %v3876_v48  ;;  %3684 = vmatpush3.bf16.msra.mxu1 %v3877_v44 }
 0x416   :  { %3663 = vmatprep.subr.bf16.mxu0 %v3878_v45  ;;  %3685 = vmatprep.subr.bf16.mxu1 %v3879_v46 }
 0x419   :  { %3664 = vmatpush3.bf16.msra.mxu0 %v3880_v47  ;;  %3686 = vmatpush3.bf16.msra.mxu1 %v3881_v50 }
 0x41a   :  { %3665 = vmatprep.subr.bf16.mxu0 %v3882_v51  ;;  %3687 = vmatprep.subr.bf16.mxu1 %v3883_v54 }
 0x41d   :  { %3666 = vmatpush3.bf16.msra.mxu0 %v3884_v52  ;;  %3688 = vmatpush3.bf16.msra.mxu1 %v3885_v55 }
 0x41e   :  { %3667 = vmatprep.subr.bf16.mxu0 %v3886_v56  ;;  %3689 = vmatprep.subr.bf16.mxu1 %v3887_v57 }
 0x421   :  { %3668 = vmatpush3.bf16.msra.mxu0 %v3888_v58  ;;  %3690 = vmatpush3.bf16.msra.mxu1 %v3889_v59 }
 0x422   :  { %3669 = vmatprep.subr.bf16.mxu0 %v3890_v60  ;;  %3691 = vmatprep.subr.bf16.mxu1 %v3891_v61 }
 0x425   :  { %3670 = vmatpush3.bf16.msra.mxu0 %v3892_v62  ;;  %3692 = vmatpush3.bf16.msra.mxu1 %v3893_v63 }
 0x47d   :  { %v2422_v9 = vpop.f32.mrb[12].mxu0 }
 0x47e   :  { %v3735_v10 = vadd.f32 %v2422_v9, %v872_v5  ;;  %v2508_v11 = vpop.f32.mrb[12].mxu1  ;;  %v2424_v14 = vpop.f32.mrb[13].mxu0 }
 0x47f   :  { %v3739_v12 = vadd.f32 %v2508_v11, %v880_v6  ;;  %v3736_v16 = vadd.f32 %v2424_v14, %v876_v7  ;;  %v2510_v19 = vpop.f32.mrb[13].mxu1  ;;  %v2426_v15 = vpop.f32.mrb[14].mxu0 }
 0x480   :  { %v3740_v20 = vadd.f32 %v2510_v19, %v884_v8  ;;  %v3737_v21 = vadd.f32 %v2426_v15, %v872_v5  ;;  %v2512_v22 = vpop.f32.mrb[14].mxu1  ;;  %v2428_v13 = vpop.f32.mrb[15].mxu0  ;;  %v2521_v25 = vmax.f32 %v3735_v10, 0.0 }
 0x481   :  { %v3741_v17 = vadd.f32 %v2512_v22, %v880_v6  ;;  %v3738_v23 = vadd.f32 %v2428_v13, %v876_v7  ;;  %v2514_v24 = vpop.f32.mrb[15].mxu1  ;;  %v2523_v27 = vmax.f32 %v3739_v12, 0.0  ;;  %v2522_v0 = vmax.f32 %v3736_v16, 0.0 }
 0x482   :  { %v2529_v18 = vmax.f32 %v3737_v21, 0.0  ;;  %v3742_v26 = vadd.f32 %v2514_v24, %v884_v8  ;;  %v2524_v30 = vmax.f32 %v3740_v20, 0.0 }
 0x483   :  { %v2531_v28 = vmax.f32 %v3741_v17, 0.0  ;;  %v2530_v29 = vmax.f32 %v3738_v23, 0.0 }
 0x484   :  { %v2666_v31 = vpack.c.bf16 %v2529_v18, %v2521_v25  ;;  %v2532_v32 = vmax.f32 %v3742_v26, 0.0 }
 0x485   :  { %v2668_v33 = vpack.c.bf16 %v2531_v28, %v2523_v27  ;;  %v2667_v53 = vpack.c.bf16 %v2530_v29, %v2522_v0 }
 0x486   :  { %v2669_v34 = vpack.c.bf16 %v2532_v32, %v2524_v30 }
 0x487   :  { %3174 = vmatprep.mubr.bf16.mxu0 %v2667_v53 }
 0x488   :  { %3215 = vmatprep.mubr.bf16.mxu1 %v2669_v34  ;;  %3175 = vmatmul.mubr.bf16.vlgmr.msra.gmra.mrb[20].mxu0 %v2666_v31 }
 0x489   :  { %3216 = vmatmul.mubr.bf16.vlgmr.msra.gmra.mrb[20].mxu1 %v2668_v33 }
 0x4db   :  { %v3627_v35 = vpop.f32.mrb[16].mxu0  ;;  %v3649_v36 = vpop.f32.mrb[16].mxu1 }
 0x4dc   :  { %v3628_v38 = vpop.f32.mrb[17].mxu0  ;;  %v3650_v39 = vpop.f32.mrb[17].mxu1 }
 0x4dd   :  { %v3629_v40 = vadd.f32 %v3628_v38, %v3627_v35  ;;  %v3651_v41 = vadd.f32 %v3650_v39, %v3649_v36  ;;  %v3630_v42 = vpop.f32.mrb[18].mxu0  ;;  %v3652_v43 = vpop.f32.mrb[18].mxu1 }
 0x4de   :  { %v3631_v49 = vpop.f32.mrb[19].mxu0  ;;  %v3653_v48 = vpop.f32.mrb[19].mxu1 }
 0x4df   :  { %v3095_v44 = vadd.f32 %v3629_v40, %v3534_v37  ;;  %v3632_v45 = vadd.f32 %v3631_v49, %v3630_v42  ;;  %v3654_v46 = vadd.f32 %v3653_v48, %v3652_v43 }
 0x4e1   :  { %v3136_v47 = vadd.f32 %v3651_v41, %v3095_v44  ;;  %v3098_v50 = vadd.f32 %v3632_v45, %v3534_v37 }
 0x4e3   :  { %v3139_v51 = vadd.f32 %v3654_v46, %v3098_v50 }
 0x55b   :  { %v3671_v54 = vpop.f32.mrb[20].mxu0 }
 0x55c   :  { %v3693_v52 = vpop.f32.mrb[20].mxu1  ;;  %v3672_v55 = vpop.f32.mrb[21].mxu0 }
 0x55d   :  { %v3673_v56 = vadd.f32 %v3672_v55, %v3671_v54  ;;  %v3694_v57 = vpop.f32.mrb[21].mxu1  ;;  %v3674_v58 = vpop.f32.mrb[22].mxu0 }
 0x55e   :  { %v3695_v59 = vadd.f32 %v3694_v57, %v3693_v52  ;;  %v3696_v60 = vpop.f32.mrb[22].mxu1  ;;  %v3675_v61 = vpop.f32.mrb[23].mxu0 }
 0x55f   :  { %v3177_v62 = vadd.f32 %v3673_v56, %v3136_v47  ;;  %v3676_v63 = vadd.f32 %v3675_v61, %v3674_v58  ;;  %v3697_v1 = vpop.f32.mrb[23].mxu1 }
 0x560   :  { %v3698_v2 = vadd.f32 %v3697_v1, %v3696_v60 }
 0x561   :  { %v3218_v3 = vadd.f32 %v3695_v59, %v3177_v62  ;;  %v3180_v4 = vadd.f32 %v3676_v63, %v3139_v51 }
 0x563   :  { %3224 = vst [vmem:[%s4231_s11] sm:$0xff] %v3218_v3  ;;  %v3221_v5 = vadd.f32 %v3698_v2, %v3180_v4 }
 0x565   :  { %3225 = vst [vmem:[%s4231_s11 + $0x8] sm:$0xff] %v3221_v5 }
 0x566   :  { %3230 = vsyncpa [#allocation3], 1 }
 0x567   :  { %3231 = vsyncpa [#allocation5], 1 }
 0x568   :  { %3232 = vsyncpa [#allocation8], 1 }

</bundles_post_ra>
